<compile_context>
chip_gen: v6e
topology: v6e:2x2x1
jax: 0.10.0
libtpu: 0.0.40
codegen_flags: <defaults>
</compile_context>

<pallas_src>
import functools

import jax
import jax.numpy as jnp
from jax.experimental import pallas as pl
from jax.experimental.pallas import tpu as pltpu


def _se_conv_bn_kernel(gate_ref, x_ref, w_ref, gamma_ref, beta_ref,
                       o_ref, gated_ref, *, eps):
    # gate_ref : (N, 1,  Cin) f32   pre-sigmoid SE gate
    # x_ref    : (N, HW, Cin) f32   activations (channels-last, flat spatial)
    # w_ref    : (Cin, TN)    bf16  1x1 conv weight slice (TN output channels)
    # gamma_ref: (1, TN) f32, beta_ref: (1, TN) f32
    # o_ref    : (M, TN)            output tile, M = N*HW
    # gated_ref: (M, Cin) bf16 VMEM scratch, persists across grid steps
    j = pl.program_id(0)
    n, hw, cin = x_ref.shape
    m = n * hw

    # Hoisted gating: computed once (j == 0), reused for every Cout tile.
    @pl.when(j == 0)
    def _():
        g = jax.nn.sigmoid(gate_ref[...])                     # (N, 1, Cin), EUP
        for n_i in range(n):                                  # static unroll, N small
            gated_ref[n_i * hw:(n_i + 1) * hw, :] = (
                g[n_i] * x_ref[n_i]).astype(gated_ref.dtype)  # (HW, Cin) bf16

    # 1x1 conv == single 2-D matmul on the MXU (bf16 operands, f32 accumulate).
    y = jnp.dot(gated_ref[...], w_ref[...],
                preferred_element_type=jnp.float32)           # (M, TN) f32

    # BatchNorm (training mode): biased batch stats per output channel,
    # single sweep for sum and sum-of-squares, affine folded into scale/shift.
    inv_count = 1.0 / float(m)
    sum_y = jnp.sum(y, axis=0, keepdims=True)                 # (1, TN)
    sum_y2 = jnp.sum(y * y, axis=0, keepdims=True)            # (1, TN)
    mean = sum_y * inv_count
    var = sum_y2 * inv_count - mean * mean
    inv = jax.lax.rsqrt(var + jnp.float32(eps))
    scale = inv * gamma_ref[...]                              # (1, TN)
    shift = beta_ref[...] - mean * scale                      # (1, TN)
    o_ref[...] = (y * scale + shift).astype(o_ref.dtype)


def se_conv_bn(x737, x741, weight, gamma, beta, *, eps=1e-3, tn=None):
    """x737: (N, Cin, H, W), x741: (N, Cin, 1, 1), weight: (Cout, Cin, 1, 1)."""
    N, Cin, H, W = x737.shape
    Cout = weight.shape[0]
    HW = H * W
    M = N * HW

    if tn is None:
        # 256-wide output tile when possible (v6e/v7x MXU is 256 wide in N).
        tn = 256 if Cout % 256 == 0 else 128
    assert Cout % tn == 0, (Cout, tn)

    # Glue: NCHW -> channels-last flat-spatial; weight -> (Cin, Cout) bf16.
    x_nhwc = jnp.transpose(x737, (0, 2, 3, 1)).reshape(N, HW, Cin)
    gate = x741.reshape(N, 1, Cin)
    w = jnp.transpose(weight.reshape(Cout, Cin), (1, 0)).astype(jnp.bfloat16)
    gamma2 = gamma.reshape(1, Cout).astype(jnp.float32)
    beta2 = beta.reshape(1, Cout).astype(jnp.float32)

    kernel = functools.partial(_se_conv_bn_kernel, eps=eps)

    out2d = pl.pallas_call(
        kernel,
        out_shape=jax.ShapeDtypeStruct((M, Cout), x737.dtype),
        grid_spec=pltpu.PrefetchScalarGridSpec(
            num_scalar_prefetch=0,
            grid=(Cout // tn,),
            in_specs=[
                pl.BlockSpec((N, 1, Cin), lambda j: (0, 0, 0)),
                pl.BlockSpec((N, HW, Cin), lambda j: (0, 0, 0)),
                pl.BlockSpec((Cin, tn), lambda j: (0, j)),
                pl.BlockSpec((1, tn), lambda j: (0, j)),
                pl.BlockSpec((1, tn), lambda j: (0, j)),
            ],
            out_specs=pl.BlockSpec((M, tn), lambda j: (0, j)),
            scratch_shapes=[pltpu.VMEM((M, Cin), jnp.bfloat16)],
        ),
        compiler_params=pltpu.CompilerParams(
            # "arbitrary": the gated-activation scratch is filled at step 0 and
            # reused, so the Cout axis must be visited sequentially on one core.
            dimension_semantics=("arbitrary",),
            vmem_limit_bytes=32 * 1024 * 1024,
        ),
    )(gate, x_nhwc, w, gamma2, beta2)

    # Glue: (M, Cout) -> NCHW.
    return jnp.transpose(out2d.reshape(N, H, W, Cout), (0, 3, 1, 2))


def _reference(x737, x741, weight, gamma, beta, eps=1e-3,
               matmul_dtype=jnp.float32):
    """Pure-JAX reference. matmul_dtype=bf16 mirrors the kernel's MXU precision."""
    N, Cin, H, W = x737.shape
    Cout = weight.shape[0]
    gated = jax.nn.sigmoid(x741) * x737                              # (N,Cin,H,W) f32
    g2 = jnp.transpose(gated, (0, 2, 3, 1)).reshape(-1, Cin).astype(matmul_dtype)
    w2 = jnp.transpose(weight.reshape(Cout, Cin), (1, 0)).astype(matmul_dtype)
    y = jnp.dot(g2, w2, preferred_element_type=jnp.float32)          # (M, Cout) f32
    mean = jnp.mean(y, axis=0, keepdims=True)
    var = jnp.mean((y - mean) ** 2, axis=0, keepdims=True)
    yn = (y - mean) * jax.lax.rsqrt(var + eps) * gamma.reshape(1, -1) \
        + beta.reshape(1, -1)
    return jnp.transpose(yn.reshape(N, H, W, Cout), (0, 3, 1, 2))


if __name__ == "__main__":
    # Small shapes consistent with the module (SE gate * feature map -> 1x1
    # conv -> BN). Cout chosen so the Cout tiling (grid of 2) is exercised.
    N, Cin, Cout, H, W = 2, 512, 512, 8, 8

    key = jax.random.PRNGKey(0)
    k1, k2, k3, k4, k5 = jax.random.split(key, 5)
    x737 = jax.random.normal(k1, (N, Cin, H, W), dtype=jnp.float32)   # feature map
    x741 = jax.random.normal(k2, (N, Cin, 1, 1), dtype=jnp.float32)   # pre-sigmoid gate
    weight = jax.random.normal(k3, (Cout, Cin, 1, 1), dtype=jnp.float32) * 0.05
    gamma = 1.0 + 0.1 * jax.random.normal(k4, (Cout,), dtype=jnp.float32)
    beta = 0.1 * jax.random.normal(k5, (Cout,), dtype=jnp.float32)

    out = jax.block_until_ready(se_conv_bn(x737, x741, weight, gamma, beta))
    assert out.shape == (N, Cout, H, W)

    # Tight check vs a reference that matches the kernel's bf16-MXU precision.
    ref_bf16 = _reference(x737, x741, weight, gamma, beta, matmul_dtype=jnp.bfloat16)
    assert jnp.allclose(out, ref_bf16, rtol=5e-3, atol=5e-3), "mismatch vs bf16 reference"

    # Loose check vs the full-f32 reference (slack covers bf16 MXU inputs).
    ref_f32 = _reference(x737, x741, weight, gamma, beta, matmul_dtype=jnp.float32)
    assert jnp.allclose(out, ref_f32, rtol=5e-2, atol=5e-2), "mismatch vs f32 reference"

    print("KERNEL_OK")
</pallas_src>

<mosaic_0001>
module attributes {stable_mosaic.version = 11 : i64} {
  func.func @_se_conv_bn_kernel(%arg0: i32, %arg1: memref<2x1x512xf32, #tpu.memory_space<vmem>>, %arg2: memref<2x64x512xf32, #tpu.memory_space<vmem>>, %arg3: memref<512x256xbf16, #tpu.memory_space<vmem>>, %arg4: memref<1x256xf32, #tpu.memory_space<vmem>>, %arg5: memref<1x256xf32, #tpu.memory_space<vmem>>, %arg6: memref<128x256xf32, #tpu.memory_space<vmem>>, %arg7: memref<128x512xbf16, #tpu.memory_space<vmem>>) attributes {dimension_semantics = [#tpu.dimension_semantics<arbitrary>], iteration_bounds = array<i64: 2>, scalar_prefetch = 0 : i64, scratch_operands = 1 : i64, tpu.core_type = #tpu.core_type<tc>, window_params = [{pipeline_mode = #tpu.pipeline_mode<synchronous>, transform_indices = @transform_0, window_bounds = array<i64: 2, 1, 512>}, {pipeline_mode = #tpu.pipeline_mode<synchronous>, transform_indices = @transform_1, window_bounds = array<i64: 2, 64, 512>}, {transform_indices = @transform_2, window_bounds = array<i64: 512, 256>}, {transform_indices = @transform_3, window_bounds = array<i64: 1, 256>}, {transform_indices = @transform_4, window_bounds = array<i64: 1, 256>}, {transform_indices = @transform_5, window_bounds = array<i64: 128, 256>}]} {
    %c0_i32 = arith.constant 0 : i32
    %0 = arith.cmpi eq, %arg0, %c0_i32 : i32
    %1 = arith.extui %0 : i1 to i32
    %c0_i32_0 = arith.constant 0 : i32
    %2 = arith.cmpi ne, %1, %c0_i32_0 : i32
    scf.if %2 {
      %c0_15 = arith.constant 0 : index
      %c0_16 = arith.constant 0 : index
      %c0_17 = arith.constant 0 : index
      %30 = vector.load %arg1[%c0_15, %c0_16, %c0_17] : memref<2x1x512xf32, #tpu.memory_space<vmem>>, vector<2x1x512xf32>
      %31 = arith.negf %30 : vector<2x1x512xf32>
      %32 = math.exp %31 : vector<2x1x512xf32>
      %cst_18 = arith.constant 1.000000e+00 : f32
      %33 = vector.broadcast %cst_18 : f32 to vector<2x1x512xf32>
      %34 = arith.addf %33, %32 : vector<2x1x512xf32>
      %35 = arith.divf %33, %34 : vector<2x1x512xf32>
      %36 = vector.extract_strided_slice %35 {offsets = [0, 0, 0], sizes = [1, 1, 512], strides = [1, 1, 1]} : vector<2x1x512xf32> to vector<1x1x512xf32>
      %37 = vector.shape_cast %36 : vector<1x1x512xf32> to vector<1x512xf32>
      %c0_19 = arith.constant 0 : index
      %c0_20 = arith.constant 0 : index
      %c0_21 = arith.constant 0 : index
      %38 = vector.load %arg2[%c0_19, %c0_20, %c0_21] : memref<2x64x512xf32, #tpu.memory_space<vmem>>, vector<1x64x512xf32>
      %39 = vector.shape_cast %38 : vector<1x64x512xf32> to vector<64x512xf32>
      %40 = vector.broadcast %37 : vector<1x512xf32> to vector<64x512xf32>
      %41 = arith.mulf %40, %39 : vector<64x512xf32>
      %42 = arith.truncf %41 : vector<64x512xf32> to vector<64x512xbf16>
      %c0_22 = arith.constant 0 : index
      %c0_23 = arith.constant 0 : index
      %43 = vector.load %arg7[%c0_22, %c0_23] : memref<128x512xbf16, #tpu.memory_space<vmem>>, vector<64x512xbf16>
      tpu.vector_store %arg7[%c0_22, %c0_23], %42 {strides = array<i32>} : memref<128x512xbf16, #tpu.memory_space<vmem>>, vector<64x512xbf16>,
      %44 = vector.extract_strided_slice %35 {offsets = [1, 0, 0], sizes = [1, 1, 512], strides = [1, 1, 1]} : vector<2x1x512xf32> to vector<1x1x512xf32>
      %45 = vector.shape_cast %44 : vector<1x1x512xf32> to vector<1x512xf32>
      %c1 = arith.constant 1 : index
      %c0_24 = arith.constant 0 : index
      %c0_25 = arith.constant 0 : index
      %46 = vector.load %arg2[%c1, %c0_24, %c0_25] : memref<2x64x512xf32, #tpu.memory_space<vmem>>, vector<1x64x512xf32>
      %47 = vector.shape_cast %46 : vector<1x64x512xf32> to vector<64x512xf32>
      %48 = vector.broadcast %45 : vector<1x512xf32> to vector<64x512xf32>
      %49 = arith.mulf %48, %47 : vector<64x512xf32>
      %50 = arith.truncf %49 : vector<64x512xf32> to vector<64x512xbf16>
      %c64 = arith.constant 64 : index
      %c0_26 = arith.constant 0 : index
      %51 = vector.load %arg7[%c64, %c0_26] : memref<128x512xbf16, #tpu.memory_space<vmem>>, vector<64x512xbf16>
      tpu.vector_store %arg7[%c64, %c0_26], %50 {strides = array<i32>} : memref<128x512xbf16, #tpu.memory_space<vmem>>, vector<64x512xbf16>,
    } else {
    }
    %c0 = arith.constant 0 : index
    %c0_1 = arith.constant 0 : index
    %3 = vector.load %arg7[%c0, %c0_1] : memref<128x512xbf16, #tpu.memory_space<vmem>>, vector<128x512xbf16>
    %c0_2 = arith.constant 0 : index
    %c0_3 = arith.constant 0 : index
    %4 = vector.load %arg3[%c0_2, %c0_3] : memref<512x256xbf16, #tpu.memory_space<vmem>>, vector<512x256xbf16>
    %cst = arith.constant dense<0.000000e+00> : vector<128x256xf32>
    %5 = tpu.matmul %3, %4, %cst {dimension_numbers = #tpu.dot_dimension_numbers<[1], [0], [0], [1], [0, 0, 1, 1], [], []>} : vector<128x512xbf16>, vector<512x256xbf16>, vector<128x256xf32> -> vector<128x256xf32>
    %cst_4 = arith.constant dense<0.000000e+00> : vector<256xf32>
    %6 = vector.multi_reduction <add>, %5, %cst_4 [0] : vector<128x256xf32> to vector<256xf32>
    %7 = vector.shape_cast %6 : vector<256xf32> to vector<1x256xf32>
    %8 = arith.mulf %5, %5 : vector<128x256xf32>
    %cst_5 = arith.constant dense<0.000000e+00> : vector<256xf32>
    %9 = vector.multi_reduction <add>, %8, %cst_5 [0] : vector<128x256xf32> to vector<256xf32>
    %10 = vector.shape_cast %9 : vector<256xf32> to vector<1x256xf32>
    %cst_6 = arith.constant 7.812500e-03 : f32
    %11 = vector.broadcast %cst_6 : f32 to vector<1x256xf32>
    %12 = arith.mulf %7, %11 : vector<1x256xf32>
    %cst_7 = arith.constant 7.812500e-03 : f32
    %13 = vector.broadcast %cst_7 : f32 to vector<1x256xf32>
    %14 = arith.mulf %10, %13 : vector<1x256xf32>
    %15 = arith.mulf %12, %12 : vector<1x256xf32>
    %16 = arith.subf %14, %15 : vector<1x256xf32>
    %cst_8 = arith.constant 1.000000e-03 : f32
    %17 = vector.broadcast %cst_8 : f32 to vector<1x256xf32>
    %18 = arith.addf %16, %17 : vector<1x256xf32>
    %19 = math.rsqrt %18 : vector<1x256xf32>
    %c0_9 = arith.constant 0 : index
    %c0_10 = arith.constant 0 : index
    %20 = vector.load %arg4[%c0_9, %c0_10] : memref<1x256xf32, #tpu.memory_space<vmem>>, vector<1x256xf32>
    %21 = arith.mulf %19, %20 : vector<1x256xf32>
    %c0_11 = arith.constant 0 : index
    %c0_12 = arith.constant 0 : index
    %22 = vector.load %arg5[%c0_11, %c0_12] : memref<1x256xf32, #tpu.memory_space<vmem>>, vector<1x256xf32>
    %23 = arith.mulf %12, %21 : vector<1x256xf32>
    %24 = arith.subf %22, %23 : vector<1x256xf32>
    %25 = vector.broadcast %21 : vector<1x256xf32> to vector<128x256xf32>
    %26 = arith.mulf %5, %25 : vector<128x256xf32>
    %27 = vector.broadcast %24 : vector<1x256xf32> to vector<128x256xf32>
    %28 = arith.addf %26, %27 : vector<128x256xf32>
    %c0_13 = arith.constant 0 : index
    %c0_14 = arith.constant 0 : index
    %29 = vector.load %arg6[%c0_13, %c0_14] : memref<128x256xf32, #tpu.memory_space<vmem>>, vector<128x256xf32>
    tpu.vector_store %arg6[%c0_13, %c0_14], %28 {strides = array<i32>} : memref<128x256xf32, #tpu.memory_space<vmem>>, vector<128x256xf32>,
    return
  }
  func.func @transform_0(%arg0: i32) -> (i32, i32, i32) {
    %c0_i32 = arith.constant 0 : i32
    %c0_i32_0 = arith.constant 0 : i32
    %c0_i32_1 = arith.constant 0 : i32
    %c0_i32_2 = arith.constant 0 : i32
    return %c0_i32, %c0_i32_0, %c0_i32_1 : i32, i32, i32
  }
  func.func @transform_1(%arg0: i32) -> (i32, i32, i32) {
    %c0_i32 = arith.constant 0 : i32
    %c0_i32_0 = arith.constant 0 : i32
    %c0_i32_1 = arith.constant 0 : i32
    %c0_i32_2 = arith.constant 0 : i32
    return %c0_i32, %c0_i32_0, %c0_i32_1 : i32, i32, i32
  }
  func.func @transform_2(%arg0: i32) -> (i32, i32) {
    %c0_i32 = arith.constant 0 : i32
    %c0_i32_0 = arith.constant 0 : i32
    return %c0_i32, %arg0 : i32, i32
  }
  func.func @transform_3(%arg0: i32) -> (i32, i32) {
    %c0_i32 = arith.constant 0 : i32
    %c0_i32_0 = arith.constant 0 : i32
    return %c0_i32, %arg0 : i32, i32
  }
  func.func @transform_4(%arg0: i32) -> (i32, i32) {
    %c0_i32 = arith.constant 0 : i32
    %c0_i32_0 = arith.constant 0 : i32
    return %c0_i32, %arg0 : i32, i32
  }
  func.func @transform_5(%arg0: i32) -> (i32, i32) {
    %c0_i32 = arith.constant 0 : i32
    %c0_i32_0 = arith.constant 0 : i32
    return %c0_i32, %arg0 : i32, i32
  }
}

</mosaic_0001>

<bundles_post_ra>
// kernel: tpu_custom_call.1
= control target key start
LH: loop header
LB: loop body
LE: loop exit
PB: predicated region body
PF: predicated region fallthrough
CT: control target
= control target key end

     0   :  { %s3255_s0 = inlined_call_operand.hbm [shape: f32[2,1,512], index: 0, kind: input, shape index: {}]   ;;  %s3256_s1 = inlined_call_operand.hbm [shape: f32[2,64,512], index: 1, kind: input, shape index: {}]   ;;  %s3257_s2 = inlined_call_operand.hbm [shape: bf16[512,512], index: 2, kind: input, shape index: {}]   ;;  %s3258_s3 = inlined_call_operand.vmem [shape: f32[1,512], index: 3, kind: input, shape index: {}]   ;;  %s3259_s4 = inlined_call_operand.hbm [shape: f32[1,512], index: 4, kind: input, shape index: {}]   ;;  %s3260_s5 = inlined_call_operand.hbm [shape: f32[128,512], index: 5, kind: output, shape index: {}]  }
   0x1   :  { %3267 = sst [smem:[#allocation17_spill]] %s3255_s0 }
   0x2   :  { %3268 = sst [smem:[#allocation18_spill]] %s3257_s2 }
   0x3   :  { %10 = vsyncpa [#allocation4], 0 }
   0x4   :  { %11 = vsyncpa [#allocation7], 0 }
   0x5   :  { %12 = vsyncpa [#allocation5], 0 }
   0x6   :  { %14 = vsyncpa [#allocation5 + $0x1], 0  ;;  %s2600_s18 = smov 0   ;;  %s2602_s19 = smov 0  }
   0x7   :  { %s2604_s20 = smov 0   ;;  %s2606_s21 = smov 0  }
   0x8 LB: > { %3269 = sst [smem:[#allocation15_spill]] %s2548_s20  ;;  %s2621_s22 = sadd.s32 4294967295, %s2552_s21   ;;  %s2552_s21 = sphi %s2606_s21, %s3295_s21   ;;  %s2548_s20 = sphi %s2604_s20, %s3292_s20   ;;  %s2544_s19 = sphi %s2602_s19, %s3294_s19   ;;  %s2540_s18 = sphi %s2600_s18, %s3293_s18  }
   0x9   : > { %s1956_s23 = sadd.s32 4294967294, %s2552_s21   ;;  %s2625_s24 = sadd.s32 1, %s2552_s21  }
   0xa   : > { %s69_s25 = sadd.s32 1, %s2548_s20  ;;  %s66_s26 = ssub.s32 %s2552_s21, %s2625_s24 }
   0xb   : > { %p76_p0 = scmp.ne.s32.totalorder %s2548_s20, %s2544_s19  ;;  %p67_p1 = scmp.eq.s32.totalorder %s66_s26, 0 }
   0xc   : > { %p77_p2 = scmp.eq.s32.totalorder %s2552_s21, 0  ;;  %p82_p3 = scmp.ne.s32.totalorder %s2544_s19, %s2540_s18 }
   0xd   : > { %p3263_p4 = scmp.eq.s32.totalorder %s2621_s22, 0  ;;  %p158_p7 = scmp.eq.s32.totalorder %s2621_s22, 1 }
   0xe   : > { %s2637_s27 = scalar_select %p67_p1, %s2548_s20, %s69_s25  }
   0xf   : > { %p2639_p5 = por %p77_p2, %p76_p0  ;;  %p2645_p6 = por %p3263_p4, %p82_p3 }
  0x10   : > { %3270 = sst [smem:[#allocation16_spill]] %s2637_s27  ;;  %p164_p8 = scmp.eq.s32.totalorder %s1956_s23, 1 }
  0x11   : > { %s3272_s29 = scalar_select %p2645_p6, 1, 0 }
  0x12   : > { %p1957_p9 = scmp.ge.s32.totalorder %s2552_s21, 1  ;;  %p171_p10 = scmp.lt.s32.totalorder %s2552_s21, 3 }
  0x13   : > { %p2652_p11 = por %p158_p7, %p76_p0  ;;  %p2656_p12 = por %p164_p8, %p82_p3 }
  0x14   : > { %p2660_p13 = pnand %p1957_p9, %p171_p10  ;;  %s2554_s8 = smov [#allocation3]  }
  0x15   : > { %s3273_s30 = scalar_select %p2652_p11, 1, 0 }
  0x16   : > { %s3274_s6 = scalar_select %p2656_p12, 1, 0 }
  0x17   : > { %s3275_s7 = scalar_select %p2660_p13, 1, 0 }
  0x18   : > { %p2159_p2 = pneg %p2660_p13  ;;  %s183_s9 = sshll.u32 %s2554_s8, 4  ;;  %s184_s9 = int_to_ptr.vmem [resolvable:$true] %s183_s9 }
  0x19   : > { %p2179_p7 = scmp.lt.s32.totalorder %s2552_s21, 2  ;;  %s210_s11 = sand.u32 1, %s2552_s21  }
  0x1a   : > { %p2669_p0 = pnand %p2159_p2, %p3263_p4  ;;  %s2383_s12 = scalar_lea.vmem %s184_s9, 128 }
  0x1b   : > { %p2384_p9 = scmp.ne.s32.totalorder %s184_s9, %s2383_s12  ;;  %p2391_p12 = scmp.lt.s32.totalorder %s184_s9, %s184_s9 }
  0x1c   : > { %p3264_p8 = pneg %p2669_p0  ;;  %p2392_p11 = scmp.lt.s32.totalorder %s2383_s12, %s2383_s12 }
  0x1e   : > { %p2386_p10 = pnand %p2384_p9, %p3264_p8  ;;  %p2393_p6 = por %p2392_p11, %p2391_p12 }
  0x20   : > { %p2387_p1 = pneg %p2386_p10 }
  0x22   : > { %p2394_p2 = pnand %p2393_p6, %p2387_p1 }
  0x24   : > { %2397 = shalt.err (!%p2394_p2)
}
  0x25   : > { %s2555_s13 = smov 64   ;;  %s2556_s14 = smov 4  }
  0x26   : > { %s3277_s0 = sld [smem:[#allocation17_spill]]  ;;  %p2690_p9 = pnand %p2179_p7, %p2639_p5 }
  0x27   : > { %s212_s23 = sand.u32 1, %s2548_s20   ;;  %s2110_s26 = sshll.u32 %s2552_s21, 7 }
  0x28   : > { %s1961_s25 = sshll.u32 %s212_s23, 9  ;;  %s3279_s2 = sld [smem:[#allocation18_spill]] }
  0x29   : > { %s214_s28 = scalar_lea.vmem [#allocation8], %s1961_s25  ;;  %p2400_p6 = pneg %p2690_p9 }
  0x2c   : > { %2162 = dma.hbm_to_vmem [thread:$0]  (!%p2669_p0), %s3277_s0, 128, %s184_s9, [#allocation4], %s2555_s13, %s2555_s13, %s2556_s14  }
  0x2d   : > { %s221_s9 = sshll.u32 %s214_s28, 4  ;;  %s2705_s13 = scalar_lea.sflag [#allocation4], %s210_s11  ;;  %s2703_s9 = int_to_ptr.vmem [resolvable:$true] %s221_s9 }
  0x2e   : > { %s2701_s27 = scalar_lea.hbm %s3279_s2, %s2110_s26  ;;  %s2403_s26 = scalar_lea.hbm %s3279_s2, 16384 }
  0x2f   : > { %s2398_s14 = scalar_lea.hbm %s2701_s27, 8192  ;;  %p2404_p1 = scmp.lt.s32.totalorder %s2701_s27, %s3279_s2 }
  0x30   : > { %p2399_p5 = scmp.ne.s32.totalorder %s2701_s27, %s2398_s14  ;;  %p2405_p7 = scmp.lt.s32.totalorder %s2403_s26, %s2398_s14 }
  0x32   : > { %p2401_p11 = pnand %p2400_p6, %p2399_p5  ;;  %p2406_p10 = por %p2405_p7, %p2404_p1 }
  0x34   : > { %p2402_p12 = pneg %p2401_p11 }
  0x36   : > { %p2407_p2 = pnand %p2406_p10, %p2402_p12 }
  0x38   : > { %2410 = shalt.err (!%p2407_p2)
}
  0x39   : > { %s2411_s11 = scalar_lea.vmem %s2703_s9, 8192  ;;  %s2557_s25 = smov [#allocation8]  }
  0x3a   : > { %p2412_p3 = scmp.ne.s32.totalorder %s2703_s9, %s2411_s11  ;;  %s2416_s28 = sshll.u32 %s2557_s25, 4  ;;  %s2417_s28 = int_to_ptr.vmem [resolvable:$false] %s2416_s28 }
  0x3b   : > { %s2418_s15 = scalar_lea.vmem %s2417_s28, 16384  ;;  %p2419_p4 = scmp.lt.s32.totalorder %s2703_s9, %s2417_s28 }
  0x3c   : > { %p2414_p5 = pnand %p2412_p3, %p2400_p6  ;;  %p2420_p8 = scmp.lt.s32.totalorder %s2418_s15, %s2411_s11 }
  0x3e   : > { %p2415_p11 = pneg %p2414_p5  ;;  %p2421_p13 = por %p2420_p8, %p2419_p4 }
  0x40   : > { %p2422_p1 = pnand %p2421_p13, %p2415_p11 }
  0x42   : > { %2425 = shalt.err (!%p2422_p1)
}
  0x43   : > { %s2558_s14 = smov 256   ;;  %s2559_s16 = smov 128  }
  0x44   : > { %s2560_s26 = smov 8   ;;  %s2561_s8 = smov [#allocation6]  }
  0x45   : > { %2169 = dma.hbm_to_vmem [thread:$0]  (!%p2690_p9), %s2701_s27, 8192, %s2703_s9, %s2705_s13, %s2558_s14, %s2559_s16, %s2560_s26  }
  0x46   : > { %s196_s12 = sshll.u32 %s2561_s8, 4  ;;  %s1964_s25 = sshll.u32 %s212_s23, 1  ;;  %s197_s12 = int_to_ptr.vmem [resolvable:$true] %s196_s12 }
  0x47   : > { %s2437_s11 = scalar_lea.vmem %s197_s12, 8192  ;;  %p3280_p13 = pneg %p2669_p0 }
  0x48   : > { %p2438_p4 = scmp.ne.s32.totalorder %s197_s12, %s2437_s11  ;;  %p2445_p12 = scmp.lt.s32.totalorder %s197_s12, %s197_s12 }
  0x49   : > { %p2446_p7 = scmp.lt.s32.totalorder %s2437_s11, %s2437_s11 }
  0x4a   : > { %p2440_p3 = pnand %p2438_p4, %p3280_p13 }
  0x4b   : > { %p2447_p10 = por %p2446_p7, %p2445_p12 }
  0x4c   : > { %p2441_p8 = pneg %p2440_p3 }
  0x4e   : > { %p2448_p2 = pnand %p2447_p10, %p2441_p8 }
  0x50   : > { %2451 = shalt.err (!%p2448_p2)
}
  0x51   : > { %s2562_s28 = smov 512   ;;  %s2563_s27 = smov 32  }
  0x52   : > { %2165 = dma.hbm_to_vmem [thread:$0]  (!%p2669_p0), %s3256_s1, 8192, %s197_s12, [#allocation7], %s2562_s28, %s2562_s28, %s2563_s27  }
  0x53   : > { %s2111_s23 = sshll.u32 %s2552_s21, 5  ;;  %s243_s8 = scalar_lea.vmem [#allocation9], %s1964_s25 }
  0x54   : > { %s249_s26 = scalar_lea.hbm %s3259_s4, %s2111_s23  ;;  %s251_s11 = sshll.u32 %s243_s8, 4  ;;  %s252_s11 = int_to_ptr.vmem [resolvable:$true] %s251_s11 }
  0x55   : > { %s2452_s0 = scalar_lea.hbm %s249_s26, 32  ;;  %s2457_s20 = scalar_lea.hbm %s3259_s4, 64 }
  0x56   : > { %p2453_p5 = scmp.ne.s32.totalorder %s249_s26, %s2452_s0  ;;  %p2458_p0 = scmp.lt.s32.totalorder %s249_s26, %s3259_s4 }
  0x57   : > { %p2459_p4 = scmp.lt.s32.totalorder %s2457_s20, %s2452_s0 }
  0x58   : > { %p2455_p11 = pnand %p2453_p5, %p2400_p6 }
  0x59   : > { %p2460_p13 = por %p2459_p4, %p2458_p0 }
  0x5a   : > { %p2456_p1 = pneg %p2455_p11 }
  0x5c   : > { %p2461_p3 = pnand %p2460_p13, %p2456_p1 }
  0x5e   : > { %2464 = shalt.err (!%p2461_p3)
}
  0x5f   : > { %s2465_s25 = scalar_lea.vmem %s252_s11, 32  ;;  %s2564_s28 = smov [#allocation9]  }
  0x60   : > { %p2466_p8 = scmp.ne.s32.totalorder %s252_s11, %s2465_s25  ;;  %s2470_s27 = sshll.u32 %s2564_s28, 4  ;;  %s2471_s27 = int_to_ptr.vmem [resolvable:$false] %s2470_s27 }
  0x61   : > { %s2472_s2 = scalar_lea.vmem %s2471_s27, 64  ;;  %p2473_p10 = scmp.lt.s32.totalorder %s252_s11, %s2471_s27 }
  0x62   : > { %p2468_p12 = pnand %p2466_p8, %p2400_p6  ;;  %p2474_p2 = scmp.lt.s32.totalorder %s2472_s2, %s2465_s25 }
  0x64   : > { %p2469_p7 = pneg %p2468_p12  ;;  %p2475_p5 = por %p2474_p2, %p2473_p10 }
  0x66   : > { %p2476_p11 = pnand %p2475_p5, %p2469_p7 }
  0x68   : > { %2479 = shalt.err (!%p2476_p11)
}
  0x69   : > { %2172 = dma.hbm_to_vmem [thread:$0]  (!%p2690_p9), %s249_s26, 32, %s252_s11, %s2705_s13  }
  0x6a   : > { %p3281_p1 = scmp.ne.s32.totalorder %s3275_s7, 0 }
  0x6b   : > { %p3282_p0 = scmp.eq.s32.totalorder (!%p3281_p1), %s2621_s22, 0 }
  0x6c   : > { %260 = sbr.rel (%p3281_p1) target bundleno = 603 (0x25b), region = 40 }
  0x71   : > { %2523 = dma.done.wait (%p3282_p0), [#allocation4], 128   ;;  %p3283_p6 = pmov %p3282_p0 }
  0x72   : > { %p3284_p4 = pmov %p3282_p0 }
  0x73   : > { %2525 = vsyncadd (%p3283_p6), [#allocation4], 4294967168 }
  0x74   : > { %2527 = dma.done.wait (%p3284_p4), [#allocation7], 8192   ;;  %p3285_p13 = pmov %p3282_p0 }
  0x75   : > { %s270_s0 = sand.u32 1, %s2621_s22   ;;  %s2773_s20 = sand.u32 1, %s2544_s19  }
  0x76   : > { %2529 = vsyncadd (%p3285_p13), [#allocation7], 4294959104  ;;  %s1970_s7 = sshll.u32 %s2773_s20, 9  ;;  %s271_s17 = scalar_lea.sflag [#allocation4], %s270_s0 }
  0x77   : > { %s2776_s13 = scalar_lea.vmem [#allocation8], %s1970_s7  ;;  %p3286_p9 = scmp.ne.s32.totalorder %s3272_s29, 0 }
  0x79   : > { %2531 = dma.done.wait (%p3286_p9), %s271_s17, 8224  }
  0x7a   : > { %2533 = vsyncadd (%p3286_p9), %s271_s17, 4294959072  ;;  %s1971_s15 = sshll.u32 %s2773_s20, 1  ;;  %s1972_s23 = sshll.u32 %s2773_s20, 8 }
  0x7b   : > { %s1973_s14 = sshll.u32 %s2621_s22, 1  ;;  %s2791_s11 = scalar_lea.vmem [#allocation9], %s1971_s15 }
  0x7c   : > { %p321_p3 = scmp.lt.s32.totalorder %s1973_s14, 3  ;;  %s2793_s10 = scalar_lea.vmem [#allocation10], %s1972_s23 }
  0x7d   : > { %p3287_p8 = scmp.ne.s32.totalorder %s2621_s22, 0 }
  0x7e   : > { %s3297_s14 = smov (!%p321_p3, %s1973_s14), 3 }
  0x7f   : > { %s323_s8 = scalar_lea.vmem %s3258_s3, %s3297_s14  ;;  %330 = sbr.rel (%p3287_p8) target bundleno = 197 (0xc5), region = 60 }
  0x84   : > { %v331_v0 = vld [vmem:[#allocation3] sm:$0xf]  ;;  %v332_v2 = vld [vmem:[#allocation3 + $0x4] sm:$0xf]  ;;  %v378_v6 = vlaneseq  ;;  %v345_v14 = vld [vmem:[#allocation6] sm:$0xff] }
  0x85   : > { %v1975_v1 = vmul.f32 -1.442695, %v331_v0  ;;  %v1976_v3 = vmul.f32 -1.442695, %v332_v2  ;;  %v346_v15 = vld [vmem:[#allocation6 + $0x8] sm:$0xff]  ;;  %v347_v17 = vld [vmem:[#allocation6 + $0x10] sm:$0xff] }
  0x86   : > { %v2797_v7 = vshrl.u32 %v378_v6, 7  ;;  %v348_v18 = vld [vmem:[#allocation6 + $0x18] sm:$0xff]  ;;  %v349_v19 = vld [vmem:[#allocation6 + $0x20] sm:$0xff]  ;;  %v350_v24 = vld [vmem:[#allocation6 + $0x28] sm:$0xff] }
  0x87   : > { %2228 = vpow2.f32 %v1975_v1  ;;  %v351_v25 = vld [vmem:[#allocation6 + $0x30] sm:$0xff]  ;;  %v352_v26 = vld [vmem:[#allocation6 + $0x38] sm:$0xff]  ;;  %v353_v27 = vld [vmem:[#allocation6 + $0x40] sm:$0xff] }
  0x88   : > { %2230 = vpow2.f32 %v1976_v3  ;;  %v380_v10 = vsub.s32 0, %v2797_v7  ;;  %v384_v11 = vsub.s32 1, %v2797_v7  ;;  %v388_v12 = vsub.s32 2, %v2797_v7  ;;  %v354_v28 = vld [vmem:[#allocation6 + $0x48] sm:$0xff]  ;;  %v355_v33 = vld [vmem:[#allocation6 + $0x50] sm:$0xff]  ;;  %v356_v34 = vld [vmem:[#allocation6 + $0x58] sm:$0xff] }
  0x89   : > { %v392_v13 = vsub.s32 3, %v2797_v7  ;;  %v357_v39 = vld [vmem:[#allocation6 + $0x60] sm:$0xff]  ;;  %v358_v40 = vld [vmem:[#allocation6 + $0x68] sm:$0xff]  ;;  %v359_v41 = vld [vmem:[#allocation6 + $0x70] sm:$0xff] }
  0x8a   : > { %v360_v46 = vld [vmem:[#allocation6 + $0x78] sm:$0xff]  ;;  %v361_v47 = vld [vmem:[#allocation6 + $0x80] sm:$0xff]  ;;  %v362_v48 = vld [vmem:[#allocation6 + $0x88] sm:$0xff] }
  0x8b   : > { %v363_v53 = vld [vmem:[#allocation6 + $0x90] sm:$0xff]  ;;  %v364_v54 = vld [vmem:[#allocation6 + $0x98] sm:$0xff]  ;;  %v365_v55 = vld [vmem:[#allocation6 + $0xa0] sm:$0xff] }
  0x8c   : > { %v366_v60 = vld [vmem:[#allocation6 + $0xa8] sm:$0xff]  ;;  %v367_v61 = vld [vmem:[#allocation6 + $0xb0] sm:$0xff]  ;;  %v368_v2 = vld [vmem:[#allocation6 + $0xb8] sm:$0xff] }
  0x8d   : > { %v369_v3 = vld [vmem:[#allocation6 + $0xc0] sm:$0xff] }
  0x94   : > { %v2229_v4 = vpop.eup %2228 }
  0x95   : > { %v339_v5 = vadd.f32 1.0, %v2229_v4  ;;  %v2231_v8 = vpop.eup %2230  ;;  %v370_v4 = vld [vmem:[#allocation6 + $0xc8] sm:$0xff] }
  0x96   : > { %v340_v9 = vadd.f32 1.0, %v2231_v8 }
  0x97   : > { %2232 = vrcp.f32 %v339_v5 }
  0x98   : > { %2234 = vrcp.f32 %v340_v9 }
  0xa4   : > { %v2233_v16 = vpop.eup %2232 }
  0xa5   : > { %v2805_v20 = vrot.slane %v2233_v16, %v380_v10  ;;  %v2809_v21 = vrot.slane %v2233_v16, %v384_v11  ;;  %v2813_v22 = vrot.slane %v2233_v16, %v388_v12  ;;  %v2817_v23 = vrot.slane %v2233_v16, %v392_v13  ;;  %v373_v16 = vld [vmem:[#allocation6 + $0xe0] sm:$0xff] }
  0xa7   : > { %v398_v29 = vmul.f32 %v2805_v20, %v345_v14  ;;  %v399_v30 = vmul.f32 %v2809_v21, %v346_v15  ;;  %v400_v31 = vmul.f32 %v2813_v22, %v347_v17  ;;  %v401_v32 = vmul.f32 %v2817_v23, %v348_v18  ;;  %v371_v14 = vld [vmem:[#allocation6 + $0xd0] sm:$0xff]  ;;  %v372_v15 = vld [vmem:[#allocation6 + $0xd8] sm:$0xff] }
  0xa8   : > { %v402_v35 = vmul.f32 %v2805_v20, %v349_v19  ;;  %v403_v36 = vmul.f32 %v2809_v21, %v350_v24  ;;  %v404_v37 = vmul.f32 %v2813_v22, %v351_v25  ;;  %v405_v38 = vmul.f32 %v2817_v23, %v352_v26  ;;  %v374_v25 = vld [vmem:[#allocation6 + $0xe8] sm:$0xff]  ;;  %v375_v26 = vld [vmem:[#allocation6 + $0xf0] sm:$0xff] }
  0xa9   : > { %v2112_v42 = vpack.c.bf16 %v399_v30, %v398_v29  ;;  %v2113_v43 = vpack.c.bf16 %v401_v32, %v400_v31  ;;  %v406_v44 = vmul.f32 %v2805_v20, %v353_v27  ;;  %v407_v45 = vmul.f32 %v2809_v21, %v354_v28  ;;  %v2235_v27 = vpop.eup %2234  ;;  %v376_v32 = vld [vmem:[#allocation6 + $0xf8] sm:$0xff] }
  0xaa   : > { %v2114_v49 = vpack.c.bf16 %v403_v36, %v402_v35  ;;  %v2115_v50 = vpack.c.bf16 %v405_v38, %v404_v37  ;;  %v408_v51 = vmul.f32 %v2813_v22, %v355_v33  ;;  %v409_v52 = vmul.f32 %v2817_v23, %v356_v34  ;;  %v543_v37 = vld [vmem:[#allocation6 + $0x100] sm:$0xff] }
  0xab   : > { %526 = vst [vmem:[#allocation2 + $0xb0] sm:$0xff] %v2112_v42  ;;  %527 = vst [vmem:[#allocation2] sm:$0xff] %v2113_v43  ;;  %v2116_v56 = vpack.c.bf16 %v407_v45, %v406_v44  ;;  %v410_v57 = vmul.f32 %v2805_v20, %v357_v39  ;;  %v411_v58 = vmul.f32 %v2809_v21, %v358_v40  ;;  %v544_v42 = vld [vmem:[#allocation6 + $0x108] sm:$0xff]  ;;  %v545_v43 = vld [vmem:[#allocation6 + $0x110] sm:$0xff] }
  0xac   : > { %v412_v59 = vmul.f32 %v2813_v22, %v359_v41  ;;  %528 = vst [vmem:[#allocation2 + $0xd8] sm:$0xff] %v2114_v49  ;;  %529 = vst [vmem:[#allocation2 + $0x18] sm:$0xff] %v2115_v50  ;;  %v2117_v62 = vpack.c.bf16 %v409_v52, %v408_v51  ;;  %v413_v63 = vmul.f32 %v2817_v23, %v360_v46  ;;  %v547_v44 = vld [vmem:[#allocation6 + $0x120] sm:$0xff]  ;;  %v548_v49 = vld [vmem:[#allocation6 + $0x128] sm:$0xff] }
  0xad   : > { %v414_v0 = vmul.f32 %v2805_v20, %v361_v47  ;;  %v415_v1 = vmul.f32 %v2809_v21, %v362_v48  ;;  %530 = vst [vmem:[#allocation2 + $0x50] sm:$0xff] %v2116_v56  ;;  %v2118_v5 = vpack.c.bf16 %v411_v58, %v410_v57  ;;  %v416_v6 = vmul.f32 %v2813_v22, %v363_v53  ;;  %v546_v48 = vld [vmem:[#allocation6 + $0x118] sm:$0xff]  ;;  %v551_v51 = vld [vmem:[#allocation6 + $0x140] sm:$0xff]  ;;  %v552_v52 = vld [vmem:[#allocation6 + $0x148] sm:$0xff] }
  0xae   : > { %v417_v8 = vmul.f32 %v2817_v23, %v364_v54  ;;  %v418_v9 = vmul.f32 %v2805_v20, %v365_v55  ;;  %531 = vst [vmem:[#allocation2 + $0x68] sm:$0xff] %v2117_v62  ;;  %v2119_v17 = vpack.c.bf16 %v413_v63, %v412_v59  ;;  %v419_v19 = vmul.f32 %v2809_v21, %v366_v60  ;;  %v553_v56 = vld [vmem:[#allocation6 + $0x150] sm:$0xff]  ;;  %v554_v57 = vld [vmem:[#allocation6 + $0x158] sm:$0xff]  ;;  %v555_v59 = vld [vmem:[#allocation6 + $0x160] sm:$0xff] }
  0xaf   : > { %v2120_v18 = vpack.c.bf16 %v415_v1, %v414_v0  ;;  %v420_v24 = vmul.f32 %v2813_v22, %v367_v61  ;;  %532 = vst [vmem:[#allocation2 + $0x30] sm:$0xff] %v2118_v5  ;;  %v421_v29 = vmul.f32 %v2817_v23, %v368_v2  ;;  %v422_v30 = vmul.f32 %v2805_v20, %v369_v3  ;;  %v556_v60 = vld [vmem:[#allocation6 + $0x168] sm:$0xff]  ;;  %v557_v1 = vld [vmem:[#allocation6 + $0x170] sm:$0xff]  ;;  %v558_v2 = vld [vmem:[#allocation6 + $0x178] sm:$0xff] }
  0xb0   : > { %v2121_v28 = vpack.c.bf16 %v417_v8, %v416_v6  ;;  %v423_v31 = vmul.f32 %v2809_v21, %v370_v4  ;;  %533 = vst [vmem:[#allocation2 + $0x48] sm:$0xff] %v2119_v17  ;;  %v2122_v33 = vpack.c.bf16 %v419_v19, %v418_v9  ;;  %v424_v34 = vmul.f32 %v2813_v22, %v371_v14  ;;  %v559_v3 = vld [vmem:[#allocation6 + $0x180] sm:$0xff]  ;;  %v560_v9 = vld [vmem:[#allocation6 + $0x188] sm:$0xff]  ;;  %v561_v14 = vld [vmem:[#allocation6 + $0x190] sm:$0xff] }
  0xb1   : > { %534 = vst [vmem:[#allocation2 + $0x80] sm:$0xff] %v2120_v18  ;;  %v425_v35 = vmul.f32 %v2817_v23, %v372_v15  ;;  %v426_v36 = vmul.f32 %v2805_v20, %v373_v16  ;;  %v2123_v38 = vpack.c.bf16 %v421_v29, %v420_v24  ;;  %v427_v40 = vmul.f32 %v2809_v21, %v374_v25  ;;  %v549_v21 = vld [vmem:[#allocation6 + $0x130] sm:$0xff]  ;;  %v562_v15 = vld [vmem:[#allocation6 + $0x198] sm:$0xff]  ;;  %v563_v24 = vld [vmem:[#allocation6 + $0x1a0] sm:$0xff] }
  0xb2   : > { %535 = vst [vmem:[#allocation2 + $0x88] sm:$0xff] %v2121_v28  ;;  %v2124_v39 = vpack.c.bf16 %v423_v31, %v422_v30  ;;  %v428_v41 = vmul.f32 %v2813_v22, %v375_v26  ;;  %536 = vst [vmem:[#allocation2 + $0xe8] sm:$0xff] %v2122_v33  ;;  %v429_v46 = vmul.f32 %v2817_v23, %v376_v32  ;;  %v564_v25 = vld [vmem:[#allocation6 + $0x1a8] sm:$0xff]  ;;  %v565_v26 = vld [vmem:[#allocation6 + $0x1b0] sm:$0xff] }
  0xb3   : > { %v2125_v45 = vpack.c.bf16 %v425_v35, %v424_v34  ;;  %v2853_v47 = vrot.slane %v2235_v27, %v380_v10  ;;  %v2857_v20 = vrot.slane %v2235_v27, %v384_v11  ;;  %537 = vst [vmem:[#allocation2 + $0xb8] sm:$0xff] %v2123_v38  ;;  %v2126_v22 = vpack.c.bf16 %v427_v40, %v426_v36  ;;  %v550_v10 = vld [vmem:[#allocation6 + $0x138] sm:$0xff]  ;;  %v567_v32 = vld [vmem:[#allocation6 + $0x1c0] sm:$0xff]  ;;  %v569_v38 = vld [vmem:[#allocation6 + $0x1d0] sm:$0xff] }
  0xb4   : > { %538 = vst [vmem:[#allocation2 + $0x60] sm:$0xff] %v2124_v39  ;;  %v2861_v50 = vrot.slane %v2235_v27, %v388_v12  ;;  %v2865_v23 = vrot.slane %v2235_v27, %v392_v13  ;;  %v2127_v11 = vpack.c.bf16 %v429_v46, %v428_v41  ;;  %v566_v31 = vld [vmem:[#allocation6 + $0x1b8] sm:$0xff]  ;;  %v573_v46 = vld [vmem:[#allocation6 + $0x1f0] sm:$0xff] }
  0xb5   : > { %539 = vst [vmem:[#allocation2 + $0xf0] sm:$0xff] %v2125_v45  ;;  %v596_v53 = vmul.f32 %v2853_v47, %v543_v37  ;;  %v597_v54 = vmul.f32 %v2857_v20, %v544_v42  ;;  %v600_v55 = vmul.f32 %v2853_v47, %v547_v44  ;;  %540 = vst [vmem:[#allocation2 + $0x8] sm:$0xff] %v2126_v22  ;;  %v568_v37 = vld [vmem:[#allocation6 + $0x1c8] sm:$0xff]  ;;  %v570_v39 = vld [vmem:[#allocation6 + $0x1d8] sm:$0xff] }
  0xb6   : > { %v598_v12 = vmul.f32 %v2861_v50, %v545_v43  ;;  %v599_v7 = vmul.f32 %v2865_v23, %v546_v48  ;;  %v601_v13 = vmul.f32 %v2857_v20, %v548_v49  ;;  %v602_v58 = vmul.f32 %v2861_v50, %v549_v21  ;;  %541 = vst [vmem:[#allocation2 + $0x78] sm:$0xff] %v2127_v11  ;;  %v571_v44 = vld [vmem:[#allocation6 + $0x1e0] sm:$0xff]  ;;  %v572_v45 = vld [vmem:[#allocation6 + $0x1e8] sm:$0xff] }
  0xb7   : > { %v2128_v61 = vpack.c.bf16 %v597_v54, %v596_v53  ;;  %v603_v62 = vmul.f32 %v2865_v23, %v550_v10  ;;  %v604_v63 = vmul.f32 %v2853_v47, %v551_v51  ;;  %v605_v0 = vmul.f32 %v2857_v20, %v552_v52  ;;  %v574_v10 = vld [vmem:[#allocation6 + $0x1f8] sm:$0xff] }
  0xb8   : > { %v2129_v4 = vpack.c.bf16 %v599_v7, %v598_v12  ;;  %v2130_v5 = vpack.c.bf16 %v601_v13, %v600_v55  ;;  %v606_v6 = vmul.f32 %v2861_v50, %v553_v56  ;;  %v607_v8 = vmul.f32 %v2865_v23, %v554_v57 }
  0xb9   : > { %724 = vst [vmem:[#allocation2 + $0x38] sm:$0xff] %v2128_v61  ;;  %v2131_v16 = vpack.c.bf16 %v603_v62, %v602_v58  ;;  %v2132_v17 = vpack.c.bf16 %v605_v0, %v604_v63  ;;  %v608_v18 = vmul.f32 %v2853_v47, %v555_v59  ;;  %v609_v19 = vmul.f32 %v2857_v20, %v556_v60 }
  0xba   : > { %725 = vst [vmem:[#allocation2 + $0x58] sm:$0xff] %v2129_v4  ;;  %726 = vst [vmem:[#allocation2 + $0x40] sm:$0xff] %v2130_v5  ;;  %v2133_v27 = vpack.c.bf16 %v607_v8, %v606_v6  ;;  %v610_v28 = vmul.f32 %v2861_v50, %v557_v1  ;;  %v611_v29 = vmul.f32 %v2865_v23, %v558_v2 }
  0xbb   : > { %v612_v30 = vmul.f32 %v2853_v47, %v559_v3  ;;  %727 = vst [vmem:[#allocation2 + $0xc8] sm:$0xff] %v2131_v16  ;;  %728 = vst [vmem:[#allocation2 + $0xe0] sm:$0xff] %v2132_v17  ;;  %v2134_v33 = vpack.c.bf16 %v609_v19, %v608_v18  ;;  %v613_v34 = vmul.f32 %v2857_v20, %v560_v9 }
  0xbc   : > { %v614_v35 = vmul.f32 %v2861_v50, %v561_v14  ;;  %v615_v36 = vmul.f32 %v2865_v23, %v562_v15  ;;  %729 = vst [vmem:[#allocation2 + $0x90] sm:$0xff] %v2133_v27  ;;  %v2135_v40 = vpack.c.bf16 %v611_v29, %v610_v28  ;;  %v616_v41 = vmul.f32 %v2853_v47, %v563_v24 }
  0xbd   : > { %v617_v42 = vmul.f32 %v2857_v20, %v564_v25  ;;  %v618_v43 = vmul.f32 %v2861_v50, %v565_v26  ;;  %730 = vst [vmem:[#allocation2 + $0x70] sm:$0xff] %v2134_v33  ;;  %v2136_v48 = vpack.c.bf16 %v613_v34, %v612_v30  ;;  %v619_v21 = vmul.f32 %v2865_v23, %v566_v31 }
  0xbe   : > { %v2137_v49 = vpack.c.bf16 %v615_v36, %v614_v35  ;;  %v620_v22 = vmul.f32 %v2853_v47, %v567_v32  ;;  %731 = vst [vmem:[#allocation2 + $0xc0] sm:$0xff] %v2135_v40  ;;  %v621_v52 = vmul.f32 %v2857_v20, %v568_v37  ;;  %v622_v11 = vmul.f32 %v2861_v50, %v569_v38 }
  0xbf   : > { %v2138_v51 = vpack.c.bf16 %v617_v42, %v616_v41  ;;  %v623_v53 = vmul.f32 %v2865_v23, %v570_v39  ;;  %732 = vst [vmem:[#allocation2 + $0xa8] sm:$0xff] %v2136_v48  ;;  %v2139_v54 = vpack.c.bf16 %v619_v21, %v618_v43  ;;  %v624_v55 = vmul.f32 %v2853_v47, %v571_v44 }
  0xc0   : > { %733 = vst [vmem:[#allocation2 + $0xd0] sm:$0xff] %v2137_v49  ;;  %v625_v56 = vmul.f32 %v2857_v20, %v572_v45  ;;  %v626_v57 = vmul.f32 %v2861_v50, %v573_v46  ;;  %v2140_v12 = vpack.c.bf16 %v621_v52, %v620_v22  ;;  %v627_v13 = vmul.f32 %v2865_v23, %v574_v10 }
  0xc1   : > { %734 = vst [vmem:[#allocation2 + $0x10] sm:$0xff] %v2138_v51  ;;  %v2141_v7 = vpack.c.bf16 %v623_v53, %v622_v11  ;;  %735 = vst [vmem:[#allocation2 + $0x28] sm:$0xff] %v2139_v54 }
  0xc2   : > { %v2142_v58 = vpack.c.bf16 %v625_v56, %v624_v55  ;;  %736 = vst [vmem:[#allocation2 + $0xa0] sm:$0xff] %v2140_v12  ;;  %v2143_v59 = vpack.c.bf16 %v627_v13, %v626_v57 }
  0xc3   : > { %737 = vst [vmem:[#allocation2 + $0xf8] sm:$0xff] %v2141_v7 }
  0xc4   : > { %738 = vst [vmem:[#allocation2 + $0x20] sm:$0xff] %v2142_v58  ;;  %739 = vst [vmem:[#allocation2 + $0x98] sm:$0xff] %v2143_v59 }
  0xc5 PF: > { %v2236_v47 = vld [vmem:[%s2776_s13 + $0x74] ss:$8 sps:$4 sm:$0xff]   ;;  %v2240_v50 = vld [vmem:[%s2776_s13 + $0x70] ss:$8 sps:$4 sm:$0xff]   ;;  %v2242_v60 = vld [vmem:[%s2776_s13 + $0x64] ss:$8 sps:$4 sm:$0xff]  }
  0xc6   : > { %v2238_v20 = vld [vmem:[%s2776_s13 + $0x174] ss:$8 sps:$4 sm:$0xff]   ;;  %1316 = vmatprep.subr.bf16.mxu0 %v2236_v47  ;;  %v2241_v23 = vld [vmem:[%s2776_s13 + $0x170] ss:$8 sps:$4 sm:$0xff]   ;;  %v2244_v61 = vld [vmem:[%s2776_s13 + $0x164] ss:$8 sps:$4 sm:$0xff]  }
  0xc7   : > { %1429 = vmatprep.subr.bf16.mxu1 %v2238_v20  ;;  %1317 = vmatpush1.bf16.msra.mxu0 %v2240_v50  ;;  %v2246_v62 = vld [vmem:[%s2776_s13 + $0x60] ss:$8 sps:$4 sm:$0xff]   ;;  %v2248_v0 = vld [vmem:[%s2776_s13 + $0x54] ss:$8 sps:$4 sm:$0xff]   ;;  %v2252_v2 = vld [vmem:[%s2776_s13 + $0x50] ss:$8 sps:$4 sm:$0xff]  }
  0xc8   : > { %1430 = vmatpush1.bf16.msra.mxu1 %v2241_v23  ;;  %1318 = vmatprep.subr.bf16.mxu0 %v2242_v60  ;;  %v2247_v63 = vld [vmem:[%s2776_s13 + $0x160] ss:$8 sps:$4 sm:$0xff]   ;;  %v2250_v1 = vld [vmem:[%s2776_s13 + $0x154] ss:$8 sps:$4 sm:$0xff]   ;;  %v2253_v3 = vld [vmem:[%s2776_s13 + $0x150] ss:$8 sps:$4 sm:$0xff]  }
  0xc9   : > { %1431 = vmatprep.subr.bf16.mxu1 %v2244_v61  ;;  %v2254_v4 = vld [vmem:[%s2776_s13 + $0x44] ss:$8 sps:$4 sm:$0xff]   ;;  %v2258_v6 = vld [vmem:[%s2776_s13 + $0x40] ss:$8 sps:$4 sm:$0xff]   ;;  %v2260_v9 = vld [vmem:[%s2776_s13 + $0x34] ss:$8 sps:$4 sm:$0xff]  }
  0xca   : > { %v2256_v5 = vld [vmem:[%s2776_s13 + $0x144] ss:$8 sps:$4 sm:$0xff]   ;;  %v2259_v8 = vld [vmem:[%s2776_s13 + $0x140] ss:$8 sps:$4 sm:$0xff]   ;;  %v2262_v14 = vld [vmem:[%s2776_s13 + $0x134] ss:$8 sps:$4 sm:$0xff]  }
  0xcb   : > { %1319 = vmatpush1.bf16.msra.mxu0 %v2246_v62  ;;  %v2264_v15 = vld [vmem:[%s2776_s13 + $0x30] ss:$8 sps:$4 sm:$0xff]   ;;  %v2266_v17 = vld [vmem:[%s2776_s13 + $0x24] ss:$8 sps:$4 sm:$0xff]   ;;  %v2270_v19 = vld [vmem:[%s2776_s13 + $0x20] ss:$8 sps:$4 sm:$0xff]  }
  0xcc   : > { %1432 = vmatpush1.bf16.msra.mxu1 %v2247_v63  ;;  %1320 = vmatprep.subr.bf16.mxu0 %v2248_v0  ;;  %v2265_v16 = vld [vmem:[%s2776_s13 + $0x130] ss:$8 sps:$4 sm:$0xff]   ;;  %v2268_v18 = vld [vmem:[%s2776_s13 + $0x124] ss:$8 sps:$4 sm:$0xff]   ;;  %v2271_v24 = vld [vmem:[%s2776_s13 + $0x120] ss:$8 sps:$4 sm:$0xff]  }
  0xcd   : > { %1433 = vmatprep.subr.bf16.mxu1 %v2250_v1  ;;  %v2272_v25 = vld [vmem:[%s2776_s13 + $0x14] ss:$8 sps:$4 sm:$0xff]   ;;  %v2276_v27 = vld [vmem:[%s2776_s13 + $0x10] ss:$8 sps:$4 sm:$0xff]   ;;  %v2278_v29 = vld [vmem:[%s2776_s13 + $0x4] ss:$8 sps:$4 sm:$0xff]  }
  0xce   : > { %v2274_v26 = vld [vmem:[%s2776_s13 + $0x114] ss:$8 sps:$4 sm:$0xff]   ;;  %v2277_v28 = vld [vmem:[%s2776_s13 + $0x110] ss:$8 sps:$4 sm:$0xff]   ;;  %v2280_v30 = vld [vmem:[%s2776_s13 + $0x104] ss:$8 sps:$4 sm:$0xff]  }
  0xcf   : > { %1321 = vmatpush1.bf16.msra.mxu0 %v2252_v2  ;;  %v2282_v31 = vld [vmem:[%s2776_s13] ss:$8 sps:$4 sm:$0xff]   ;;  %v2284_v33 = vld [vmem:[%s2776_s13 + $0xf4] ss:$8 sps:$4 sm:$0xff]   ;;  %v2288_v35 = vld [vmem:[%s2776_s13 + $0xf0] ss:$8 sps:$4 sm:$0xff]  }
  0xd0   : > { %1434 = vmatpush1.bf16.msra.mxu1 %v2253_v3  ;;  %1322 = vmatprep.subr.bf16.mxu0 %v2254_v4  ;;  %v2283_v32 = vld [vmem:[%s2776_s13 + $0x100] ss:$8 sps:$4 sm:$0xff]   ;;  %v2286_v34 = vld [vmem:[%s2776_s13 + $0x1f4] ss:$8 sps:$4 sm:$0xff]   ;;  %v2289_v36 = vld [vmem:[%s2776_s13 + $0x1f0] ss:$8 sps:$4 sm:$0xff]  }
  0xd1   : > { %1435 = vmatprep.subr.bf16.mxu1 %v2256_v5  ;;  %v2290_v37 = vld [vmem:[%s2776_s13 + $0xe4] ss:$8 sps:$4 sm:$0xff]   ;;  %v2294_v39 = vld [vmem:[%s2776_s13 + $0xe0] ss:$8 sps:$4 sm:$0xff]   ;;  %v2296_v41 = vld [vmem:[%s2776_s13 + $0xd4] ss:$8 sps:$4 sm:$0xff]  }
  0xd2   : > { %v2292_v38 = vld [vmem:[%s2776_s13 + $0x1e4] ss:$8 sps:$4 sm:$0xff]   ;;  %v2295_v40 = vld [vmem:[%s2776_s13 + $0x1e0] ss:$8 sps:$4 sm:$0xff]   ;;  %v2298_v42 = vld [vmem:[%s2776_s13 + $0x1d4] ss:$8 sps:$4 sm:$0xff]  }
  0xd3   : > { %1323 = vmatpush1.bf16.msra.mxu0 %v2258_v6  ;;  %v2300_v43 = vld [vmem:[%s2776_s13 + $0xd0] ss:$8 sps:$4 sm:$0xff]   ;;  %v2302_v45 = vld [vmem:[%s2776_s13 + $0xc4] ss:$8 sps:$4 sm:$0xff]   ;;  %v2306_v48 = vld [vmem:[%s2776_s13 + $0xc0] ss:$8 sps:$4 sm:$0xff]  }
  0xd4   : > { %1436 = vmatpush1.bf16.msra.mxu1 %v2259_v8  ;;  %1324 = vmatprep.subr.bf16.mxu0 %v2260_v9  ;;  %v2301_v44 = vld [vmem:[%s2776_s13 + $0x1d0] ss:$8 sps:$4 sm:$0xff]   ;;  %v2304_v46 = vld [vmem:[%s2776_s13 + $0x1c4] ss:$8 sps:$4 sm:$0xff]   ;;  %v2307_v21 = vld [vmem:[%s2776_s13 + $0x1c0] ss:$8 sps:$4 sm:$0xff]  }
  0xd5   : > { %1437 = vmatprep.subr.bf16.mxu1 %v2262_v14  ;;  %v2334_v49 = vld [vmem:[#allocation2 + $0xb4] ss:$40 sps:$4 sm:$0xff]   ;;  %v2312_v52 = vld [vmem:[%s2776_s13 + $0xb0] ss:$8 sps:$4 sm:$0xff]   ;;  %v2318_v55 = vld [vmem:[%s2776_s13 + $0xa0] ss:$8 sps:$4 sm:$0xff]  }
  0xd6   : > { %v2308_v22 = vld [vmem:[%s2776_s13 + $0xb4] ss:$8 sps:$4 sm:$0xff]   ;;  %1348 = vmatprep.mubr.bf16.mxu0 %v2334_v49  ;;  %v2313_v11 = vld [vmem:[%s2776_s13 + $0x1b0] ss:$8 sps:$4 sm:$0xff]   ;;  %v2314_v53 = vld [vmem:[%s2776_s13 + $0xa4] ss:$8 sps:$4 sm:$0xff]  }
  0xd7   : > { %1325 = vmatpush1.bf16.msra.mxu0 %v2264_v15  ;;  %v2310_v10 = vld [vmem:[%s2776_s13 + $0x1b4] ss:$8 sps:$4 sm:$0xff]   ;;  %v2316_v54 = vld [vmem:[%s2776_s13 + $0x1a4] ss:$8 sps:$4 sm:$0xff]   ;;  %v2319_v56 = vld [vmem:[%s2776_s13 + $0x1a0] ss:$8 sps:$4 sm:$0xff]  }
  0xd8   : > { %1438 = vmatpush1.bf16.msra.mxu1 %v2265_v16  ;;  %1326 = vmatprep.subr.bf16.mxu0 %v2266_v17  ;;  %v2337_v51 = vld [vmem:[#allocation2 + $0x4] ss:$24 sps:$4 sm:$0xff]   ;;  %v2324_v7 = vld [vmem:[%s2776_s13 + $0x90] ss:$8 sps:$4 sm:$0xff]   ;;  %v2326_v58 = vld [vmem:[%s2776_s13 + $0x84] ss:$8 sps:$4 sm:$0xff]  }
  0xd9   : > { %1439 = vmatprep.subr.bf16.mxu1 %v2268_v18  ;;  %1461 = vmatprep.mubr.bf16.mxu1 %v2337_v51  ;;  %v2320_v57 = vld [vmem:[%s2776_s13 + $0x94] ss:$8 sps:$4 sm:$0xff]   ;;  %v2325_v13 = vld [vmem:[%s2776_s13 + $0x190] ss:$8 sps:$4 sm:$0xff]   ;;  %v2328_v59 = vld [vmem:[%s2776_s13 + $0x184] ss:$8 sps:$4 sm:$0xff]  }
  0xda   : > { %v2322_v12 = vld [vmem:[%s2776_s13 + $0x194] ss:$8 sps:$4 sm:$0xff]   ;;  %v2330_v47 = vld [vmem:[%s2776_s13 + $0x80] ss:$8 sps:$4 sm:$0xff]   ;;  %v2335_v63 = vld [vmem:[#allocation2] ss:$24 sps:$4 sm:$0xff]  }
  0xdb   : > { %1327 = vmatpush1.bf16.msra.mxu0 %v2270_v19  ;;  %v2331_v20 = vld [vmem:[%s2776_s13 + $0x180] ss:$8 sps:$4 sm:$0xff]   ;;  %v2338_v4 = vld [vmem:[#allocation2 + $0x84] ss:$104 sps:$4 sm:$0xff]   ;;  %v2346_v14 = vld [vmem:[#allocation2 + $0xf4] ss:$-120 sps:$4 sm:$0xff]  }
  0xdc   : > { %1440 = vmatpush1.bf16.msra.mxu1 %v2271_v24  ;;  %1328 = vmatprep.subr.bf16.mxu0 %v2272_v25  ;;  %v744_v50 = vld [vmem:[#allocation2 + $0x50] sm:$0xff]  ;;  %v745_v60 = vld [vmem:[#allocation2 + $0x68] sm:$0xff]  ;;  %v2350_v17 = vld [vmem:[#allocation2 + $0x3c] ss:$8 sps:$4 sm:$0xff]   ;;  %s2144_s12 = sshll.u32 %s2621_s22, 8  ;;  %s1835_s25 = sshll.u32 %s2793_s10, 4  ;;  %s3198_s25 = int_to_ptr.vmem [resolvable:$true] %s1835_s25 }
  0xdd   : > { %1441 = vmatprep.subr.bf16.mxu1 %v2274_v26  ;;  %v746_v23 = vld [vmem:[#allocation2 + $0x30] sm:$0xff]  ;;  %v747_v61 = vld [vmem:[#allocation2 + $0x48] sm:$0xff]  ;;  %v2354_v19 = vld [vmem:[#allocation2 + $0x38] ss:$8 sps:$4 sm:$0xff]   ;;  %s3190_s27 = scalar_lea.hbm %s3260_s5, %s2144_s12  ;;  %s1822_s2 = scalar_lea.sflag [#allocation5], %s2773_s20 }
  0xde   : > { %v2332_v62 = vld [vmem:[#allocation2 + $0xb0] ss:$40 sps:$4 sm:$0xff]   ;;  %v2014_v0 = vcombine.high %v744_v50, %v746_v23  ;;  %v2016_v1 = vcombine.high %v745_v60, %v747_v61  ;;  %v2013_v2 = vcombine.low %v744_v50, %v746_v23  ;;  %v2015_v3 = vcombine.low %v745_v60, %v747_v61  ;;  %v2340_v5 = vld [vmem:[#allocation2 + $0x8c] ss:$48 sps:$4 sm:$0xff]   ;;  %v2342_v6 = vld [vmem:[#allocation2 + $0x80] ss:$104 sps:$4 sm:$0xff]  }
  0xdf   : > { %1329 = vmatpush1.bf16.msra.mxu0 %v2276_v27  ;;  %v2343_v8 = vld [vmem:[#allocation2 + $0x88] ss:$48 sps:$4 sm:$0xff]   ;;  %v2344_v9 = vld [vmem:[#allocation2 + $0x64] ss:$-88 sps:$4 sm:$0xff]   ;;  %v2360_v27 = vld [vmem:[#allocation2 + $0xe0] ss:$-112 sps:$4 sm:$0xff]  }
  0xe0   : > { %1442 = vmatpush1.bf16.msra.mxu1 %v2277_v28  ;;  %1330 = vmatprep.subr.bf16.mxu0 %v2278_v29  ;;  %v2348_v15 = vld [vmem:[#allocation2 + $0x60] ss:$-88 sps:$4 sm:$0xff]   ;;  %v2349_v16 = vld [vmem:[#allocation2 + $0xf0] ss:$-120 sps:$4 sm:$0xff]   ;;  %v2352_v18 = vld [vmem:[#allocation2 + $0x5c] ss:$112 sps:$4 sm:$0xff]  }
  0xe1   : > { %1443 = vmatprep.subr.bf16.mxu1 %v2280_v30  ;;  %v2355_v24 = vld [vmem:[#allocation2 + $0x58] ss:$112 sps:$4 sm:$0xff]   ;;  %v2356_v25 = vld [vmem:[#allocation2 + $0xe4] ss:$-112 sps:$4 sm:$0xff]   ;;  %v2361_v28 = vld [vmem:[#allocation2 + $0x90] ss:$48 sps:$4 sm:$0xff]  }
  0xe2   : > { %v2358_v26 = vld [vmem:[#allocation2 + $0x94] ss:$48 sps:$4 sm:$0xff]   ;;  %s2480_s0 = scalar_lea.vmem %s3198_s25, 4096  ;;  %p3288_p7 = scmp.ne.s32.totalorder %s3273_s30, 0 }
  0xe3   : > { %1331 = vmatpush1.bf16.msra.mxu0 %v2282_v31  ;;  %v2362_v29 = vld [vmem:[#allocation2 + $0xac] ss:$-152 sps:$4 sm:$0xff]   ;;  %v768_v31 = vld [vmem:[#allocation2 + $0xa0] sm:$0xff]  ;;  %p2481_p12 = scmp.ne.s32.totalorder %s3198_s25, %s2480_s0  ;;  %s2566_s7 = smov [#allocation10]  }
  0xe4   : > { %1444 = vmatpush1.bf16.msra.mxu1 %v2283_v32  ;;  %1332 = vmatprep.subr.bf16.mxu0 %v2284_v33  ;;  %v2364_v30 = vld [vmem:[#allocation2 + $0xd4] ss:$-168 sps:$4 sm:$0xff]   ;;  %v770_v32 = vld [vmem:[#allocation2 + $0x20] sm:$0xff]  ;;  %v769_v33 = vld [vmem:[#allocation2 + $0xf8] sm:$0xff]  ;;  %s2484_s17 = sshll.u32 %s2566_s7, 4  ;;  %s2485_s17 = int_to_ptr.vmem [resolvable:$false] %s2484_s17 }
  0xe5   : > { %1445 = vmatprep.subr.bf16.mxu1 %v2286_v34  ;;  %v771_v34 = vld [vmem:[#allocation2 + $0x98] sm:$0xff]  ;;  %p2482_p10 = pnand %p2481_p12, %p3288_p7  ;;  %s2486_s13 = scalar_lea.vmem %s2485_s17, 8192 }
  0xe6   : > { %p2487_p5 = scmp.lt.s32.totalorder %s3198_s25, %s2485_s17  ;;  %p2488_p11 = scmp.lt.s32.totalorder %s2486_s13, %s2480_s0 }
  0xe7   : > { %1333 = vmatpush2.bf16.msra.mxu0 %v2288_v35  ;;  %v2366_v35 = vld [vmem:[#allocation2 + $0xa8] ss:$-152 sps:$4 sm:$0xff]   ;;  %p2483_p2 = pneg %p2482_p10 }
  0xe8   : > { %1446 = vmatpush2.bf16.msra.mxu1 %v2289_v36  ;;  %1334 = vmatprep.subr.bf16.mxu0 %v2290_v37  ;;  %v2367_v36 = vld [vmem:[#allocation2 + $0xd0] ss:$-168 sps:$4 sm:$0xff]   ;;  %v2038_v37 = vcombine.high %v768_v31, %v770_v32  ;;  %p2489_p1 = por %p2488_p11, %p2487_p5 }
  0xe9   : > { %1447 = vmatprep.subr.bf16.mxu1 %v2292_v38  ;;  %v2040_v38 = vcombine.high %v769_v33, %v771_v34 }
  0xea   : > { %p2490_p0 = pnand %p2489_p1, %p2483_p2 }
  0xeb   : > { %1335 = vmatpush2.bf16.msra.mxu0 %v2294_v39  ;;  %v2037_v39 = vcombine.low %v768_v31, %v770_v32 }
  0xec   : > { %1448 = vmatpush2.bf16.msra.mxu1 %v2295_v40  ;;  %1336 = vmatprep.subr.bf16.mxu0 %v2296_v41  ;;  %v2039_v40 = vcombine.low %v769_v33, %v771_v34 }
  0xed   : > { %1449 = vmatprep.subr.bf16.mxu1 %v2298_v42 }
  0xef   : > { %1337 = vmatpush2.bf16.msra.mxu0 %v2300_v43 }
  0xf0   : > { %1450 = vmatpush2.bf16.msra.mxu1 %v2301_v44  ;;  %1338 = vmatprep.subr.bf16.mxu0 %v2302_v45 }
  0xf1   : > { %1451 = vmatprep.subr.bf16.mxu1 %v2304_v46 }
  0xf3   : > { %1339 = vmatpush2.bf16.msra.mxu0 %v2306_v48 }
  0xf4   : > { %1452 = vmatpush2.bf16.msra.mxu1 %v2307_v21  ;;  %1340 = vmatprep.subr.bf16.mxu0 %v2308_v22 }
  0xf5   : > { %1453 = vmatprep.subr.bf16.mxu1 %v2310_v10 }
  0xf7   : > { %1341 = vmatpush2.bf16.msra.mxu0 %v2312_v52 }
  0xf8   : > { %1454 = vmatpush2.bf16.msra.mxu1 %v2313_v11  ;;  %1342 = vmatprep.subr.bf16.mxu0 %v2314_v53 }
  0xf9   : > { %1455 = vmatprep.subr.bf16.mxu1 %v2316_v54 }
  0xfb   : > { %1343 = vmatpush2.bf16.msra.mxu0 %v2318_v55 }
  0xfc   : > { %1456 = vmatpush2.bf16.msra.mxu1 %v2319_v56  ;;  %1344 = vmatprep.subr.bf16.mxu0 %v2320_v57 }
  0xfd   : > { %1457 = vmatprep.subr.bf16.mxu1 %v2322_v12 }
  0xff   : > { %1345 = vmatpush2.bf16.msra.mxu0 %v2324_v7 }
 0x100   : > { %1458 = vmatpush2.bf16.msra.mxu1 %v2325_v13  ;;  %1346 = vmatprep.subr.bf16.mxu0 %v2326_v58 }
 0x101   : > { %1459 = vmatprep.subr.bf16.mxu1 %v2328_v59 }
 0x103   : > { %1347 = vmatpush2.bf16.msra.mxu0 %v2330_v47 }
 0x104   : > { %1460 = vmatpush2.bf16.msra.mxu1 %v2331_v20 }
 0x106   : > { %1349 = vmatmul.mubr.bf16.vlgmr.msra.gmra.mxu0 %v2332_v62 }
 0x107   : > { %1462 = vmatmul.mubr.bf16.vlgmr.msra.gmra.mxu1 %v2335_v63  ;;  %1358 = vmatprep.mubr.bf16.mxu0 %v2014_v0 }
 0x108   : > { %1471 = vmatprep.mubr.bf16.mxu1 %v2016_v1 }
 0x10e   : > { %1359 = vmatmul.mubr.bf16.gmra.mxu0 %v2013_v2 }
 0x10f   : > { %1472 = vmatmul.mubr.bf16.gmra.mxu1 %v2015_v3  ;;  %1368 = vmatprep.mubr.bf16.mxu0 %v2338_v4 }
 0x110   : > { %1481 = vmatprep.mubr.bf16.mxu1 %v2340_v5 }
 0x116   : > { %1369 = vmatmul.mubr.bf16.gmra.mxu0 %v2342_v6 }
 0x117   : > { %1482 = vmatmul.mubr.bf16.gmra.mxu1 %v2343_v8  ;;  %1378 = vmatprep.mubr.bf16.mxu0 %v2344_v9 }
 0x118   : > { %1491 = vmatprep.mubr.bf16.mxu1 %v2346_v14 }
 0x11e   : > { %1379 = vmatmul.mubr.bf16.gmra.mxu0 %v2348_v15 }
 0x11f   : > { %1492 = vmatmul.mubr.bf16.gmra.mxu1 %v2349_v16  ;;  %1388 = vmatprep.mubr.bf16.mxu0 %v2350_v17 }
 0x120   : > { %1501 = vmatprep.mubr.bf16.mxu1 %v2352_v18 }
 0x126   : > { %1389 = vmatmul.mubr.bf16.gmra.mxu0 %v2354_v19 }
 0x127   : > { %1502 = vmatmul.mubr.bf16.gmra.mxu1 %v2355_v24  ;;  %1398 = vmatprep.mubr.bf16.mxu0 %v2356_v25 }
 0x128   : > { %1511 = vmatprep.mubr.bf16.mxu1 %v2358_v26 }
 0x12e   : > { %1399 = vmatmul.mubr.bf16.gmra.mxu0 %v2360_v27 }
 0x12f   : > { %1512 = vmatmul.mubr.bf16.gmra.mxu1 %v2361_v28  ;;  %1408 = vmatprep.mubr.bf16.mxu0 %v2362_v29 }
 0x130   : > { %1521 = vmatprep.mubr.bf16.mxu1 %v2364_v30 }
 0x136   : > { %1409 = vmatmul.mubr.bf16.gmra.mxu0 %v2366_v35 }
 0x137   : > { %1522 = vmatmul.mubr.bf16.gmra.mxu1 %v2367_v36  ;;  %1418 = vmatprep.mubr.bf16.mxu0 %v2038_v37 }
 0x138   : > { %1531 = vmatprep.mubr.bf16.mxu1 %v2040_v38 }
 0x13e   : > { %1419 = vmatmul.mubr.bf16.gmra.mxu0 %v2037_v39 }
 0x13f   : > { %1532 = vmatmul.mubr.bf16.gmra.mxu1 %v2039_v40 }
 0x1c6   : > { %v1350_v41 = vpop.f32.mrf.mxu0 }
 0x1c7   : > { %v1463_v42 = vpop.f32.mrf.mxu1 }
 0x1c8   : > { %v1352_v43 = vpop.f32.mrf.mxu0  ;;  %v2967_v0 = vadd.f32 %v1463_v42, %v1350_v41 }
 0x1c9   : > { %v1465_v44 = vpop.f32.mrf.mxu1 }
 0x1ca   : > { %v1354_v45 = vpop.f32.mrf.mxu0  ;;  %v2971_v2 = vadd.f32 %v1465_v44, %v1352_v43  ;;  %v1584_v17 = vmul.f32 %v2967_v0, %v2967_v0 }
 0x1cb   : > { %v1467_v46 = vpop.f32.mrf.mxu1 }
 0x1cc   : > { %v1356_v48 = vpop.f32.mrf.mxu0  ;;  %v2963_v60 = vadd.f32 %v1467_v46, %v1354_v45  ;;  %v1585_v24 = vmul.f32 %v2971_v2, %v2971_v2 }
 0x1cd   : > { %v1469_v49 = vpop.f32.mrf.mxu1 }
 0x1ce   : > { %v1360_v21 = vpop.f32.mrf.mxu0  ;;  %v2965_v61 = vadd.f32 %v1469_v49, %v1356_v48  ;;  %v1586_v6 = vmul.f32 %v2963_v60, %v2963_v60  ;;  %v1542_v25 = vadd.f32 %v2963_v60, %v2967_v0 }
 0x1cf   : > { %v1473_v22 = vpop.f32.mrf.mxu1 }
 0x1d0   : > { %v1362_v10 = vpop.f32.mrf.mxu0  ;;  %v2969_v1 = vadd.f32 %v1473_v22, %v1360_v21  ;;  %v1587_v9 = vmul.f32 %v2965_v61, %v2965_v61  ;;  %v1616_v30 = vadd.f32 %v1586_v6, %v1584_v17  ;;  %v1563_v31 = vadd.f32 %v2965_v61, %v2971_v2 }
 0x1d1   : > { %v1475_v51 = vpop.f32.mrf.mxu1 }
 0x1d2   : > { %v1364_v52 = vpop.f32.mrf.mxu0  ;;  %v2973_v3 = vadd.f32 %v1475_v51, %v1362_v10  ;;  %v1588_v18 = vmul.f32 %v2969_v1, %v2969_v1  ;;  %v1637_v34 = vadd.f32 %v1587_v9, %v1585_v24  ;;  %v1543_v35 = vadd.f32 %v1542_v25, %v2969_v1 }
 0x1d3   : > { %v1477_v11 = vpop.f32.mrf.mxu1 }
 0x1d4   : > { %v1366_v53 = vpop.f32.mrf.mxu0  ;;  %v2977_v8 = vadd.f32 %v1477_v11, %v1364_v52  ;;  %v1589_v26 = vmul.f32 %v2973_v3, %v2973_v3  ;;  %v1617_v40 = vadd.f32 %v1616_v30, %v1588_v18  ;;  %v1564_v43 = vadd.f32 %v1563_v31, %v2973_v3 }
 0x1d5   : > { %v1479_v54 = vpop.f32.mrf.mxu1 }
 0x1d6   : > { %v1370_v55 = vpop.f32.mrf.mxu0  ;;  %v2981_v14 = vadd.f32 %v1479_v54, %v1366_v53  ;;  %v1590_v32 = vmul.f32 %v2977_v8, %v2977_v8  ;;  %v1638_v44 = vadd.f32 %v1637_v34, %v1589_v26  ;;  %v1544_v45 = vadd.f32 %v1543_v35, %v2977_v8 }
 0x1d7   : > { %v1483_v56 = vpop.f32.mrf.mxu1 }
 0x1d8   : > { %v1372_v57 = vpop.f32.mrf.mxu0  ;;  %v2987_v19 = vadd.f32 %v1483_v56, %v1370_v55  ;;  %v1591_v36 = vmul.f32 %v2981_v14, %v2981_v14  ;;  %v1618_v21 = vadd.f32 %v1617_v40, %v1590_v32  ;;  %v1565_v52 = vadd.f32 %v1564_v43, %v2981_v14 }
 0x1d9   : > { %v1485_v12 = vpop.f32.mrf.mxu1 }
 0x1da   : > { %v1374_v7 = vpop.f32.mrf.mxu0  ;;  %v2995_v27 = vadd.f32 %v1485_v12, %v1372_v57  ;;  %v1592_v41 = vmul.f32 %v2987_v19, %v2987_v19  ;;  %v1639_v11 = vadd.f32 %v1638_v44, %v1591_v36  ;;  %v1545_v53 = vadd.f32 %v1544_v45, %v2987_v19 }
 0x1db   : > { %v1487_v13 = vpop.f32.mrf.mxu1 }
 0x1dc   : > { %v1376_v58 = vpop.f32.mrf.mxu0  ;;  %v3001_v33 = vadd.f32 %v1487_v13, %v1374_v7  ;;  %v1593_v46 = vmul.f32 %v2995_v27, %v2995_v27  ;;  %v1619_v57 = vadd.f32 %v1618_v21, %v1592_v41 }
 0x1dd   : > { %v1489_v59 = vpop.f32.mrf.mxu1 }
 0x1de   : > { %v1380_v47 = vpop.f32.mrf.mxu0  ;;  %v3006_v37 = vadd.f32 %v1489_v59, %v1376_v58  ;;  %v1594_v22 = vmul.f32 %v3001_v33, %v3001_v33  ;;  %v1566_v58 = vadd.f32 %v1565_v52, %v2995_v27  ;;  %v1640_v59 = vadd.f32 %v1639_v11, %v1593_v46 }
 0x1df   : > { %v1493_v20 = vpop.f32.mrf.mxu1 }
 0x1e0   : > { %v1382_v50 = vpop.f32.mrf.mxu0  ;;  %v3010_v42 = vadd.f32 %v1493_v20, %v1380_v47  ;;  %v1595_v54 = vmul.f32 %v3006_v37, %v3006_v37  ;;  %v1546_v47 = vadd.f32 %v1545_v53, %v3001_v33 }
 0x1e1   : > { %v1495_v23 = vpop.f32.mrf.mxu1 }
 0x1e2   : > { %v1384_v62 = vpop.f32.mrf.mxu0  ;;  %v3018_v10 = vadd.f32 %v1495_v23, %v1382_v50  ;;  %v1596_v12 = vmul.f32 %v3010_v42, %v3010_v42  ;;  %v1620_v23 = vadd.f32 %v1619_v57, %v1594_v22  ;;  %v1547_v17 = vadd.f32 %v1546_v47, %v3010_v42 }
 0x1e3   : > { %v1497_v63 = vpop.f32.mrf.mxu1 }
 0x1e4   : > { %v1386_v4 = vpop.f32.mrf.mxu0  ;;  %v3020_v51 = vadd.f32 %v1497_v63, %v1384_v62  ;;  %v1597_v62 = vmul.f32 %v3018_v10, %v3018_v10  ;;  %v1621_v18 = vadd.f32 %v1620_v23, %v1596_v12 }
 0x1e5   : > { %v1499_v5 = vpop.f32.mrf.mxu1 }
 0x1e6   : > { %v1390_v15 = vpop.f32.mrf.mxu0  ;;  %v3028_v7 = vadd.f32 %v1499_v5, %v1386_v4  ;;  %v1598_v63 = vmul.f32 %v3020_v51, %v3020_v51  ;;  %v1567_v4 = vadd.f32 %v1566_v58, %v3006_v37  ;;  %v1641_v5 = vadd.f32 %v1640_v59, %v1595_v54 }
 0x1e7   : > { %v1503_v16 = vpop.f32.mrf.mxu1  ;;  %v1548_v34 = vadd.f32 %v1547_v17, %v3020_v51 }
 0x1e8   : > { %v1392_v28 = vpop.f32.mrf.mxu0  ;;  %v3030_v13 = vadd.f32 %v1503_v16, %v1390_v15  ;;  %v1599_v24 = vmul.f32 %v3028_v7, %v3028_v7  ;;  %v1568_v26 = vadd.f32 %v1567_v4, %v3018_v10  ;;  %v1642_v32 = vadd.f32 %v1641_v5, %v1597_v62 }
 0x1e9   : > { %v1505_v29 = vpop.f32.mrf.mxu1  ;;  %v1622_v35 = vadd.f32 %v1621_v18, %v1598_v63 }
 0x1ea   : > { %v1394_v38 = vpop.f32.mrf.mxu0  ;;  %v3038_v6 = vadd.f32 %v1505_v29, %v1392_v28  ;;  %v1600_v25 = vmul.f32 %v3030_v13, %v3030_v13  ;;  %v1569_v44 = vadd.f32 %v1568_v26, %v3028_v7  ;;  %v1643_v45 = vadd.f32 %v1642_v32, %v1599_v24 }
 0x1eb   : > { %v1507_v39 = vpop.f32.mrf.mxu1  ;;  %v1549_v46 = vadd.f32 %v1548_v34, %v3030_v13 }
 0x1ec   : > { %v1396_v48 = vpop.f32.mrf.mxu0  ;;  %v3041_v9 = vadd.f32 %v1507_v39, %v1394_v38  ;;  %v1601_v36 = vmul.f32 %v3038_v6, %v3038_v6  ;;  %v1570_v54 = vadd.f32 %v1569_v44, %v3038_v6 }
 0x1ed   : > { %v1509_v49 = vpop.f32.mrf.mxu1 }
 0x1ee   : > { %v1400_v55 = vpop.f32.mrf.mxu0  ;;  %v3049_v28 = vadd.f32 %v1509_v49, %v1396_v48  ;;  %v1602_v38 = vmul.f32 %v3041_v9, %v3041_v9  ;;  %v1623_v48 = vadd.f32 %v1622_v35, %v1600_v25 }
 0x1ef   : > { %v1513_v56 = vpop.f32.mrf.mxu1 }
 0x1f0   : > { %v1402_v20 = vpop.f32.mrf.mxu0  ;;  %v3051_v29 = vadd.f32 %v1513_v56, %v1400_v55  ;;  %v1603_v49 = vmul.f32 %v3049_v28, %v3049_v28  ;;  %v1644_v55 = vadd.f32 %v1643_v45, %v1601_v36  ;;  %v1550_v56 = vadd.f32 %v1549_v46, %v3041_v9 }
 0x1f1   : > { %v1515_v50 = vpop.f32.mrf.mxu1  ;;  %v1624_v57 = vadd.f32 %v1623_v48, %v1602_v38 }
 0x1f2   : > { %v1404_v15 = vpop.f32.mrf.mxu0  ;;  %v3058_v39 = vadd.f32 %v1515_v50, %v1402_v20  ;;  %v1604_v21 = vmul.f32 %v3051_v29, %v3051_v29  ;;  %v1571_v50 = vadd.f32 %v1570_v54, %v3049_v28  ;;  %v1551_v23 = vadd.f32 %v1550_v56, %v3051_v29 }
 0x1f3   : > { %v1517_v16 = vpop.f32.mrf.mxu1  ;;  %v1645_v63 = vadd.f32 %v1644_v55, %v1603_v49 }
 0x1f4   : > { %v1406_v30 = vpop.f32.mrf.mxu0  ;;  %v3060_v40 = vadd.f32 %v1517_v16, %v1404_v15  ;;  %v1605_v12 = vmul.f32 %v3058_v39, %v3058_v39  ;;  %v1625_v4 = vadd.f32 %v1624_v57, %v1604_v21  ;;  %v1572_v18 = vadd.f32 %v1571_v50, %v3058_v39 }
 0x1f5   : > { %v1519_v31 = vpop.f32.mrf.mxu1 }
 0x1f6   : > { %v1410_v41 = vpop.f32.mrf.mxu0  ;;  %v3068_v22 = vadd.f32 %v1519_v31, %v1406_v30  ;;  %v1606_v58 = vmul.f32 %v3060_v40, %v3060_v40  ;;  %v1552_v24 = vadd.f32 %v1551_v23, %v3060_v40  ;;  %v1646_v26 = vadd.f32 %v1645_v63, %v1605_v12 }
 0x1f7   : > { %v1523_v43 = vpop.f32.mrf.mxu1 }
 0x1f8   : > { %v3070_v52 = vadd.f32 %v1523_v43, %v1410_v41  ;;  %v1412_v11 = vpop.f32.mrf.mxu0  ;;  %v1607_v5 = vmul.f32 %v3068_v22, %v3068_v22  ;;  %v1626_v30 = vadd.f32 %v1625_v4, %v1606_v58  ;;  %v1573_v36 = vadd.f32 %v1572_v18, %v3068_v22 }
 0x1f9   : > { %v1525_v53 = vpop.f32.mrf.mxu1 }
 0x1fa   : > { %v3078_v59 = vadd.f32 %v1525_v53, %v1412_v11  ;;  %v1414_v47 = vpop.f32.mrf.mxu0  ;;  %v1608_v15 = vmul.f32 %v3070_v52, %v3070_v52  ;;  %v1553_v38 = vadd.f32 %v1552_v24, %v3070_v52  ;;  %v1647_v43 = vadd.f32 %v1646_v26, %v1607_v5 }
 0x1fb   : > { %v1527_v20 = vpop.f32.mrf.mxu1 }
 0x1fc   : > { %v3082_v62 = vadd.f32 %v1527_v20, %v1414_v47  ;;  %v1416_v16 = vpop.f32.mrf.mxu0  ;;  %v1609_v31 = vmul.f32 %v3078_v59, %v3078_v59  ;;  %v1627_v44 = vadd.f32 %v1626_v30, %v1608_v15  ;;  %v1574_v49 = vadd.f32 %v1573_v36, %v3078_v59 }
 0x1fd   : > { %v1529_v17 = vpop.f32.mrf.mxu1 }
 0x1fe   : > { %v3090_v25 = vadd.f32 %v1529_v17, %v1416_v16  ;;  %v1610_v32 = vmul.f32 %v3082_v62, %v3082_v62  ;;  %v1420_v34 = vpop.f32.mrf.mxu0  ;;  %v1554_v21 = vadd.f32 %v1553_v38, %v3082_v62  ;;  %v1648_v54 = vadd.f32 %v1647_v43, %v1609_v31 }
 0x1ff   : > { %v1533_v35 = vpop.f32.mrf.mxu1 }
 0x200   : > { %v3098_v41 = vadd.f32 %v1533_v35, %v1420_v34  ;;  %v1611_v45 = vmul.f32 %v3090_v25, %v3090_v25  ;;  %v1422_v46 = vpop.f32.mrf.mxu0  ;;  %v1628_v55 = vadd.f32 %v1627_v44, %v1610_v32  ;;  %v1575_v12 = vadd.f32 %v1574_v49, %v3090_v25 }
 0x201   : > { %v1535_v48 = vpop.f32.mrf.mxu1 }
 0x202   : > { %v1612_v11 = vmul.f32 %v3098_v41, %v3098_v41  ;;  %v3106_v53 = vadd.f32 %v1535_v48, %v1422_v46  ;;  %v1424_v56 = vpop.f32.mrf.mxu0  ;;  %v1555_v58 = vadd.f32 %v1554_v21, %v3098_v41  ;;  %v1649_v50 = vadd.f32 %v1648_v54, %v1611_v45 }
 0x203   : > { %v1537_v57 = vpop.f32.mrf.mxu1 }
 0x204   : > { %v1613_v47 = vmul.f32 %v3106_v53, %v3106_v53  ;;  %v3112_v20 = vadd.f32 %v1537_v57, %v1424_v56  ;;  %v1629_v23 = vadd.f32 %v1628_v55, %v1612_v11  ;;  %v1426_v63 = vpop.f32.mrf.mxu0  ;;  %v1576_v5 = vadd.f32 %v1575_v12, %v3106_v53 }
 0x205   : > { %v1539_v4 = vpop.f32.mrf.mxu1 }
 0x206   : > { %v1556_v15 = vadd.f32 %v1555_v58, %v3112_v20  ;;  %v1614_v16 = vmul.f32 %v3112_v20, %v3112_v20  ;;  %v3118_v17 = vadd.f32 %v1539_v4, %v1426_v63  ;;  %v1650_v18 = vadd.f32 %v1649_v50, %v1613_v47 }
 0x208   : > { %v1557_v24 = vrot.slane %v1556_v15, 4  ;;  %v1630_v26 = vadd.f32 %v1629_v23, %v1614_v16  ;;  %v1577_v30 = vadd.f32 %v1576_v5, %v3118_v17  ;;  %v1615_v31 = vmul.f32 %v3118_v17, %v3118_v17 }
 0x20a   : > { %v1558_v32 = vadd.f32 %v1557_v24, %v1556_v15  ;;  %v1631_v34 = vrot.slane %v1630_v26, 4  ;;  %v1578_v35 = vrot.slane %v1577_v30, 4  ;;  %v1651_v36 = vadd.f32 %v1650_v18, %v1615_v31 }
 0x20c   : > { %v1559_v38 = vrot.slane %v1558_v32, 2  ;;  %v1632_v43 = vadd.f32 %v1631_v34, %v1630_v26  ;;  %v1579_v44 = vadd.f32 %v1578_v35, %v1577_v30  ;;  %v1652_v45 = vrot.slane %v1651_v36, 4 }
 0x20d   : > { %v1672_v34 = vlaneseq }
 0x20e   : > { %v1560_v46 = vadd.f32 %v1559_v38, %v1558_v32  ;;  %v1633_v48 = vrot.slane %v1632_v43, 2  ;;  %v1580_v49 = vrot.slane %v1579_v44, 2  ;;  %v1653_v21 = vadd.f32 %v1652_v45, %v1651_v36 }
 0x20f   : > { %v1673_v36 = vshrl.u32 %v1672_v34, 7 }
 0x210   : > { %v1561_v11 = vrot.slane %v1560_v46, 1  ;;  %v1634_v54 = vadd.f32 %v1633_v48, %v1632_v43  ;;  %v1581_v55 = vadd.f32 %v1580_v49, %v1579_v44  ;;  %v1654_v56 = vrot.slane %v1653_v21, 2  ;;  %v1670_v43 = vld [vmem:[%s323_s8] sm:$0x3] }
 0x211   : > { %v1674_v38 = vsub.s32 0, %v1673_v36  ;;  %v1678_v44 = vsub.s32 1, %v1673_v36  ;;  %v2565_v49 = vmov 1966171168  }
 0x212   : > { %v1562_v57 = vadd.f32 %v1561_v11, %v1560_v46  ;;  %v1635_v12 = vrot.slane %v1634_v54, 1  ;;  %v1582_v58 = vrot.slane %v1581_v55, 1  ;;  %v1655_v47 = vadd.f32 %v1654_v56, %v1653_v21 }
 0x213   : > { %v1675_v45 = vrot.slane %v1670_v43, %v1674_v38  ;;  %v1679_v48 = vrot.slane %v1670_v43, %v1678_v44  ;;  %v1691_v21 = vunpack.c.l.s4 %v2565_v49 }
 0x214   : > { %v1636_v50 = vadd.f32 %v1635_v12, %v1634_v54  ;;  %v1658_v23 = vmul.f32 0.0078125, %v1562_v57  ;;  %v1583_v63 = vadd.f32 %v1582_v58, %v1581_v55  ;;  %v1656_v4 = vrot.slane %v1655_v47, 1 }
 0x215   : > { %v1692_v56 = vunpack.c.0.s8 %v1691_v21 }
 0x216   : > { %v1660_v5 = vmul.f32 0.0078125, %v1636_v50  ;;  %v1662_v15 = vmul.f32 %v1658_v23, %v1658_v23  ;;  %v1657_v16 = vadd.f32 %v1656_v4, %v1655_v47  ;;  %v1659_v18 = vmul.f32 0.0078125, %v1583_v63 }
 0x217   : > { %v1695_v47 = vsub.s32 %v1692_v56, %v1673_v36 }
 0x218   : > { %v1664_v24 = vsub.f32 %v1660_v5, %v1662_v15  ;;  %v1661_v26 = vmul.f32 0.0078125, %v1657_v16  ;;  %v1663_v30 = vmul.f32 %v1659_v18, %v1659_v18 }
 0x21a   : > { %v1666_v31 = vadd.f32 0.001, %v1664_v24  ;;  %v1665_v32 = vsub.f32 %v1661_v26, %v1663_v30 }
 0x21c   : > { %2368 = vrsqrt.f32 %v1666_v31  ;;  %v1667_v35 = vadd.f32 0.001, %v1665_v32  ;;  %v1684_v32 = vld [vmem:[%s2791_s11] sm:$0x3] }
 0x21e   : > { %2370 = vrsqrt.f32 %v1667_v35 }
 0x229   : > { %v2369_v46 = vpop.eup %2368 }
 0x22a   : > { %v1682_v54 = vmul.f32 %v2369_v46, %v1675_v45 }
 0x22b   : > { %v2371_v11 = vpop.eup %2370 }
 0x22c   : > { %v1683_v55 = vmul.f32 %v2371_v11, %v1679_v48  ;;  %v1709_v57 = vrot.slane %v1682_v54, %v1674_v38  ;;  %v1685_v12 = vmul.f32 %v1682_v54, %v1658_v23 }
 0x22e   : > { %v1686_v58 = vmul.f32 %v1683_v55, %v1659_v18  ;;  %v1714_v50 = vmul.f32 %v1709_v57, %v2967_v0  ;;  %v1716_v63 = vmul.f32 %v1709_v57, %v2963_v60  ;;  %v1718_v5 = vmul.f32 %v1709_v57, %v2969_v1 }
 0x22f   : > { %v1720_v15 = vmul.f32 %v1709_v57, %v2977_v8  ;;  %v1722_v16 = vmul.f32 %v1709_v57, %v2987_v19  ;;  %v1713_v24 = vrot.slane %v1683_v55, %v1674_v38  ;;  %v1724_v26 = vmul.f32 %v1709_v57, %v3001_v33 }
 0x230   : > { %v1689_v4 = vcombine.low %v1685_v12, %v1686_v58  ;;  %v1726_v30 = vmul.f32 %v1709_v57, %v3010_v42  ;;  %v1728_v23 = vmul.f32 %v1709_v57, %v3020_v51  ;;  %v1730_v31 = vmul.f32 %v1709_v57, %v3030_v13 }
 0x231   : > { %v1732_v0 = vmul.f32 %v1709_v57, %v3041_v9  ;;  %v1734_v60 = vmul.f32 %v1709_v57, %v3051_v29  ;;  %v1736_v1 = vmul.f32 %v1709_v57, %v3060_v40  ;;  %v3142_v8 = vmul.f32 %v1709_v57, %v3070_v52 }
 0x232   : > { %v1696_v18 = vrot.slane %v1689_v4, %v1695_v47  ;;  %v3145_v19 = vmul.f32 %v1709_v57, %v3082_v62  ;;  %v3148_v33 = vmul.f32 %v1709_v57, %v3098_v41  ;;  %v3151_v51 = vmul.f32 %v1709_v57, %v3112_v20 }
 0x233   : > { %v1715_v13 = vmul.f32 %v1713_v24, %v2971_v2  ;;  %v1717_v9 = vmul.f32 %v1713_v24, %v2965_v61  ;;  %v1719_v29 = vmul.f32 %v1713_v24, %v2973_v3  ;;  %v1721_v52 = vmul.f32 %v1713_v24, %v2981_v14 }
 0x234   : > { %v1703_v42 = vrot.slane %v1696_v18, %v1695_v47  ;;  %v1723_v34 = vmul.f32 %v1713_v24, %v2995_v27  ;;  %v1725_v62 = vmul.f32 %v1713_v24, %v3006_v37  ;;  %v1727_v41 = vmul.f32 %v1713_v24, %v3018_v10 }
 0x235   : > { %v1729_v35 = vmul.f32 %v1713_v24, %v3028_v7  ;;  %v1731_v20 = vmul.f32 %v1713_v24, %v3038_v6  ;;  %v1733_v36 = vmul.f32 %v1713_v24, %v3049_v28  ;;  %v1735_v2 = vmul.f32 %v1713_v24, %v3058_v39 }
 0x236   : > { %v1705_v40 = vsub.f32 %v1684_v32, %v1703_v42  ;;  %v1737_v61 = vmul.f32 %v1713_v24, %v3068_v22  ;;  %v1739_v14 = vmul.f32 %v1713_v24, %v3078_v59  ;;  %v1741_v27 = vmul.f32 %v1713_v24, %v3090_v25 }
 0x237   : > { %v1743_v37 = vmul.f32 %v1713_v24, %v3106_v53  ;;  %v1745_v10 = vmul.f32 %v1713_v24, %v3118_v17 }
 0x238   : > { %v1750_v3 = vrot.slane %v1705_v40, %v1674_v38  ;;  %v1754_v43 = vrot.slane %v1705_v40, %v1678_v44 }
 0x23a   : > { %v1757_v7 = vadd.f32 %v1750_v3, %v1714_v50  ;;  %v1758_v6 = vadd.f32 %v1754_v43, %v1715_v13  ;;  %v1759_v28 = vadd.f32 %v1750_v3, %v1716_v63  ;;  %v1760_v39 = vadd.f32 %v1754_v43, %v1717_v9 }
 0x23b   : > { %v1761_v22 = vadd.f32 %v1750_v3, %v1718_v5  ;;  %v1762_v38 = vadd.f32 %v1754_v43, %v1719_v29  ;;  %v1763_v44 = vadd.f32 %v1750_v3, %v1720_v15  ;;  %v1764_v59 = vadd.f32 %v1754_v43, %v1721_v52 }
 0x23c   : > { %v1765_v25 = vadd.f32 %v1750_v3, %v1722_v16  ;;  %v1766_v45 = vadd.f32 %v1754_v43, %v1723_v34  ;;  %v1767_v53 = vadd.f32 %v1750_v3, %v1724_v26  ;;  %v1768_v46 = vadd.f32 %v1754_v43, %v1725_v62  ;;  %1789 = vst [vmem:[%s2793_s10] sm:$0xff] %v1757_v7 }
 0x23d   : > { %1790 = vst [vmem:[%s2793_s10 + $0x8] sm:$0xff] %v1758_v6  ;;  %1791 = vst [vmem:[%s2793_s10 + $0x10] sm:$0xff] %v1759_v28  ;;  %v1769_v17 = vadd.f32 %v1750_v3, %v1726_v30  ;;  %v1770_v48 = vadd.f32 %v1754_v43, %v1727_v41  ;;  %v1771_v49 = vadd.f32 %v1750_v3, %v1728_v23 }
 0x23e   : > { %1792 = vst [vmem:[%s2793_s10 + $0x18] sm:$0xff] %v1760_v39  ;;  %v1772_v21 = vadd.f32 %v1754_v43, %v1729_v35  ;;  %1793 = vst [vmem:[%s2793_s10 + $0x20] sm:$0xff] %v1761_v22  ;;  %v1773_v11 = vadd.f32 %v1750_v3, %v1730_v31  ;;  %v1774_v54 = vadd.f32 %v1754_v43, %v1731_v20 }
 0x23f   : > { %1794 = vst [vmem:[%s2793_s10 + $0x28] sm:$0xff] %v1762_v38  ;;  %1795 = vst [vmem:[%s2793_s10 + $0x30] sm:$0xff] %v1763_v44  ;;  %v1775_v55 = vadd.f32 %v1750_v3, %v1732_v0  ;;  %v1776_v56 = vadd.f32 %v1754_v43, %v1733_v36  ;;  %v1777_v57 = vadd.f32 %v1750_v3, %v1734_v60 }
 0x240   : > { %1796 = vst [vmem:[%s2793_s10 + $0x38] sm:$0xff] %v1764_v59  ;;  %1797 = vst [vmem:[%s2793_s10 + $0x40] sm:$0xff] %v1765_v25  ;;  %v1778_v12 = vadd.f32 %v1754_v43, %v1735_v2  ;;  %v1779_v58 = vadd.f32 %v1750_v3, %v1736_v1  ;;  %v1780_v47 = vadd.f32 %v1754_v43, %v1737_v61 }
 0x241   : > { %1798 = vst [vmem:[%s2793_s10 + $0x48] sm:$0xff] %v1766_v45  ;;  %1799 = vst [vmem:[%s2793_s10 + $0x50] sm:$0xff] %v1767_v53  ;;  %v1781_v50 = vadd.f32 %v1750_v3, %v3142_v8  ;;  %v1782_v63 = vadd.f32 %v1754_v43, %v1739_v14  ;;  %v1783_v4 = vadd.f32 %v1750_v3, %v3145_v19 }
 0x242   : > { %1800 = vst [vmem:[%s2793_s10 + $0x58] sm:$0xff] %v1768_v46  ;;  %1801 = vst [vmem:[%s2793_s10 + $0x60] sm:$0xff] %v1769_v17  ;;  %v1784_v5 = vadd.f32 %v1754_v43, %v1741_v27  ;;  %v1785_v15 = vadd.f32 %v1750_v3, %v3148_v33  ;;  %v1786_v16 = vadd.f32 %v1754_v43, %v1743_v37 }
 0x243   : > { %1802 = vst [vmem:[%s2793_s10 + $0x68] sm:$0xff] %v1770_v48  ;;  %1803 = vst [vmem:[%s2793_s10 + $0x70] sm:$0xff] %v1771_v49  ;;  %v1787_v24 = vadd.f32 %v1750_v3, %v3151_v51  ;;  %v1788_v26 = vadd.f32 %v1754_v43, %v1745_v10 }
 0x244   : > { %1804 = vst [vmem:[%s2793_s10 + $0x78] sm:$0xff] %v1772_v21  ;;  %1805 = vst [vmem:[%s2793_s10 + $0x80] sm:$0xff] %v1773_v11 }
 0x245   : > { %1806 = vst [vmem:[%s2793_s10 + $0x88] sm:$0xff] %v1774_v54  ;;  %1807 = vst [vmem:[%s2793_s10 + $0x90] sm:$0xff] %v1775_v55 }
 0x246   : > { %1808 = vst [vmem:[%s2793_s10 + $0x98] sm:$0xff] %v1776_v56  ;;  %1809 = vst [vmem:[%s2793_s10 + $0xa0] sm:$0xff] %v1777_v57 }
 0x247   : > { %1810 = vst [vmem:[%s2793_s10 + $0xa8] sm:$0xff] %v1778_v12  ;;  %1811 = vst [vmem:[%s2793_s10 + $0xb0] sm:$0xff] %v1779_v58 }
 0x248   : > { %1812 = vst [vmem:[%s2793_s10 + $0xb8] sm:$0xff] %v1780_v47  ;;  %1813 = vst [vmem:[%s2793_s10 + $0xc0] sm:$0xff] %v1781_v50 }
 0x249   : > { %1814 = vst [vmem:[%s2793_s10 + $0xc8] sm:$0xff] %v1782_v63  ;;  %1815 = vst [vmem:[%s2793_s10 + $0xd0] sm:$0xff] %v1783_v4 }
 0x24a   : > { %1816 = vst [vmem:[%s2793_s10 + $0xd8] sm:$0xff] %v1784_v5  ;;  %1817 = vst [vmem:[%s2793_s10 + $0xe0] sm:$0xff] %v1785_v15 }
 0x24b   : > { %1818 = vst [vmem:[%s2793_s10 + $0xe8] sm:$0xff] %v1786_v16  ;;  %1819 = vst [vmem:[%s2793_s10 + $0xf0] sm:$0xff] %v1787_v24 }
 0x24c   : > { %1820 = vst [vmem:[%s2793_s10 + $0xf8] sm:$0xff] %v1788_v26 }
 0x24d   : > { %2493 = shalt.err (!%p2490_p0)
}
 0x24e   : > { %s2494_s15 = scalar_lea.hbm %s3190_s27, 4096  ;;  %s2498_s16 = scalar_lea.hbm %s3260_s5, 8192 }
 0x24f   : > { %p2495_p6 = scmp.ne.s32.totalorder %s3190_s27, %s2494_s15  ;;  %p2499_p9 = scmp.lt.s32.totalorder %s3190_s27, %s3260_s5 }
 0x250   : > { %p2500_p3 = scmp.lt.s32.totalorder %s2498_s16, %s2494_s15 }
 0x251   : > { %p2496_p4 = pnand %p2495_p6, %p3288_p7 }
 0x252   : > { %p2501_p8 = por %p2500_p3, %p2499_p9 }
 0x253   : > { %p2497_p13 = pneg %p2496_p4 }
 0x255   : > { %p2502_p12 = pnand %p2501_p8, %p2497_p13 }
 0x257   : > { %2505 = shalt.err (!%p2502_p12)
}
 0x258   : > { %s2567_s11 = smov 256   ;;  %s2568_s10 = smov 512  }
 0x259   : > { %s2569_s29 = smov 16  }
 0x25a   : > { %2157 = dma.vmem_to_hbm [thread:$0]  (%p3288_p7), %s3198_s25, 4096, %s3190_s27, %s1822_s2, %s2567_s11, %s2568_s10, %s2569_s29  }
 0x25b PF: > { %s1850_s9 = sand.u32 1, %s2540_s18   ;;  %p3289_p10 = scmp.ne.s32.totalorder %s3274_s6, 0 }
 0x25c   : > { %p3290_p2 = scmp.ge.s32.totalorder %s2552_s21, 2  ;;  %s1851_s12 = scalar_lea.sflag [#allocation5], %s1850_s9 }
 0x25e   : > { %p2174_p5 = pnand %p3290_p2, %p3289_p10 }
 0x260   : > { %p2175_p11 = pneg %p2174_p5 }
 0x262   : > { %2535 = dma.done.wait (%p2175_p11), %s1851_s12, 4096  }
 0x263   : > { %2537 = vsyncadd (%p2175_p11), %s1851_s12, 4294963200  ;;  %s3291_s22 = sld [smem:[#allocation15_spill]]  ;;  %p17_p1 = scmp.ge.s32.totalorder %s2625_s24, 4  }
 0x264   : > { %s3292_s20 = sld [smem:[#allocation16_spill]]  ;;  %s3293_s18 = smov %s2544_s19 }
 0x265   : > { %s3295_s21 = smov %s2625_s24  ;;  %19 = sbr.rel (!%p17_p1) target bundleno = 8 (0x8), region = 111 }
 0x269   : > { %s3294_s19 = smov %s3291_s22 }
 0x26a   :  { %1856 = vsyncpa [#allocation4], 1 }
 0x26b   :  { %1858 = vsyncpa [#allocation4 + $0x1], 1 }
 0x26c   :  { %1859 = vsyncpa [#allocation7], 1 }
 0x26d   :  { %1860 = vsyncpa [#allocation5], 1 }
 0x26e   :  { %1862 = vsyncpa [#allocation5 + $0x1], 1 }

</bundles_post_ra>
